<compile_context>
chip_gen: v6e
topology: v6e:2x2x1
jax: 0.10.0
libtpu: 0.0.40
codegen_flags: <defaults>
</compile_context>

<pallas_src>
import functools

import jax
import jax.numpy as jnp
from jax import lax
from jax.experimental import pallas as pl
from jax.experimental.pallas import tpu as pltpu

MATMUL_DTYPE = jnp.bfloat16   # MXU input dtype for all streaming-phase dots
LANE = 128
NEG_BIG = -1e30


def _round_up(x, m):
    return (x + m - 1) // m * m


def _pad2(a, shape, dtype=jnp.float32):
    out = jnp.zeros(shape, dtype)
    return out.at[:a.shape[0], :a.shape[1]].set(a.astype(dtype))


def _make_mil_kernel(n_true, tile_n, ep, dp):
    """Builds the online-softmax attention-MIL kernel (closes over static sizes)."""
    needs_tail_mask = (n_true % tile_n) != 0

    def kernel(feats_ref, w_cat_ref, b_cat_ref, w_a2t_ref, b_a2c_ref,
               w_bef_ref, b_bef_ref, w_fc_ref, b_fc_ref,
               y_ref, feat_ref, m_sc, l_sc, acc_sc):
        i = pl.program_id(0)

        @pl.when(i == 0)
        def _init():
            m_sc[...] = jnp.full(m_sc.shape, -jnp.inf, m_sc.dtype)
            l_sc[...] = jnp.zeros(l_sc.shape, l_sc.dtype)
            acc_sc[...] = jnp.zeros(acc_sc.shape, acc_sc.dtype)

        # ---- per-tile work -------------------------------------------------
        # One fused bf16 MXU matmul produces both the embedding and the
        # pre-tanh attention hidden layer (lanes [0:Ep) and [Ep:Ep+Dp)).
        feats = feats_ref[...].astype(MATMUL_DTYPE)
        fused = jnp.dot(feats, w_cat_ref[...],
                        preferred_element_type=jnp.float32) + b_cat_ref[...]
        emb = fused[:, :ep]                    # (T, Ep)
        h = jnp.tanh(fused[:, ep:])            # (T, Dp)

        if needs_tail_mask:
            # Only compiled in when the bag does not divide the tile.  The emb
            # row mask guards against garbage (possibly NaN/Inf) HBM rows in
            # the overhanging tile reaching acc via 0*NaN; the column mask
            # keeps padded rows out of the softmax.
            remaining = n_true - i * tile_n
            row_valid = lax.broadcasted_iota(jnp.int32, (tile_n, 1), 0) < remaining
            col_valid = lax.broadcasted_iota(jnp.int32, (1, tile_n), 1) < remaining
            emb = jnp.where(row_valid, emb, 0.0)

        # attention scores, produced transposed (class axis on sublanes) so the
        # softmax stats broadcast along lanes without in-kernel transposes.
        a_t = lax.dot_general(w_a2t_ref[...], h.astype(MATMUL_DTYPE),
                              (((1,), (1,)), ((), ())),
                              preferred_element_type=jnp.float32) + b_a2c_ref[...]
        if needs_tail_mask:
            a_t = jnp.where(col_valid, a_t, NEG_BIG)   # (Kp, T)

        # Online softmax over the bag axis, per class row.
        m_old = m_sc[...]                                          # (Kp, 1)
        m_new = jnp.maximum(m_old, jnp.max(a_t, axis=1, keepdims=True))
        alpha = jnp.exp(m_old - m_new)                             # (Kp, 1)
        p = jnp.exp(a_t - m_new)                                   # (Kp, T)
        l_sc[...] = alpha * l_sc[...] + jnp.sum(p, axis=1, keepdims=True)
        acc_sc[...] = acc_sc[...] * alpha + jnp.dot(
            p.astype(MATMUL_DTYPE), emb.astype(MATMUL_DTYPE),
            preferred_element_type=jnp.float32)                    # (Kp, Ep)
        m_sc[...] = m_new

        # ---- finalize on the last tile --------------------------------------
        @pl.when(i == pl.num_programs(0) - 1)
        def _finalize():
            inv_l = pl.reciprocal(l_sc[...], approx=False)         # (Kp, 1)
            wsi = acc_sc[...] * inv_l                              # (Kp, Ep)
            # torch: wsi_embedding.view(-1, E*K) -> Linear(E*K, E): one fused
            # matmul on the row-major flattened (1, Kp*Ep) vector.  Padded
            # classes/lanes hit zero rows of w_bef, so padding never leaks.
            flat = wsi.reshape(1, wsi.shape[0] * wsi.shape[1]).astype(MATMUL_DTYPE)
            cls = jnp.dot(flat, w_bef_ref[...],
                          preferred_element_type=jnp.float32) + b_bef_ref[...]
            cls = jnp.maximum(cls, 0.0)             # ReLU; dropout = identity
            feat_ref[...] = cls.astype(feat_ref.dtype)
            y_ref[...] = (jnp.dot(cls, w_fc_ref[...],
                                  preferred_element_type=jnp.float32)
                          + b_fc_ref[...]).astype(y_ref.dtype)

    return kernel


def prepare_kernel_params(params, F, E, D, K):
    """One-time weight layout: pad hidden dims lane-dense, fuse emb+attn-hidden.

    Call once per model and reuse across forward calls (the padding / fusion
    work is amortized away from the per-bag latency path).
    """
    Ep = _round_up(E, LANE)
    Dp = _round_up(D, LANE)
    Kp = max(_round_up(K, 8), 8)

    w_emb = params["w_emb"].astype(jnp.float32)    # (F, E)
    b_emb = params["b_emb"].astype(jnp.float32)    # (1, E)
    w_a1 = params["w_a1"].astype(jnp.float32)      # (E, D)
    b_a1 = params["b_a1"].astype(jnp.float32)      # (1, D)

    # Fuse Linear(F->E) with Linear(E->D): no nonlinearity between them.
    w_combo = w_emb @ w_a1                         # (F, D)
    b_combo = b_emb @ w_a1 + b_a1                  # (1, D)

    w_cat = jnp.zeros((F, Ep + Dp), jnp.float32)
    w_cat = w_cat.at[:, :E].set(w_emb).at[:, Ep:Ep + D].set(w_combo)
    w_cat = w_cat.astype(MATMUL_DTYPE)             # single bf16 MXU operand
    b_cat = jnp.zeros((1, Ep + Dp), jnp.float32)
    b_cat = b_cat.at[:, :E].set(b_emb).at[:, Ep:Ep + D].set(b_combo)

    # Attention output layer stored transposed (Kp, Dp) / (Kp, 1) so the kernel
    # produces class-on-sublane scores without any in-kernel transpose.
    w_a2t = _pad2(params["w_a2"].T, (Kp, Dp), MATMUL_DTYPE)
    b_a2c = _pad2(params["b_a2"].T, (Kp, 1))

    # embedding_before_fc: logical weight is (K*E, E) with row index k*E + e
    # (= torch W.T).  The kernel flattens wsi (Kp, Ep) row-major, so rows move
    # to k*Ep + e; padded rows stay zero.  Stored bf16 (finalize-only use).
    w_bef3 = params["w_bef"].reshape(K, E, E)
    w_bef = jnp.zeros((Kp, Ep, Ep), jnp.float32)
    w_bef = w_bef.at[:K, :E, :E].set(w_bef3).reshape(Kp * Ep, Ep)
    w_bef = w_bef.astype(MATMUL_DTYPE)
    b_bef = _pad2(params["b_bef"], (1, Ep))
    w_fc = _pad2(params["w_fc"], (Ep, Kp))
    b_fc = _pad2(params["b_fc"], (1, Kp))

    weights = (w_cat, b_cat, w_a2t, b_a2c, w_bef, b_bef, w_fc, b_fc)
    return weights, (Ep, Dp, Kp), (E, K)


def mil_forward(conv_layers_out, prepared, *, tile_n=1024):
    """Attention-MIL head.  Returns (Y_prob (K,), features_image (1, E))."""
    weights, (Ep, Dp, Kp), (E, K) = prepared
    N, F = conv_layers_out.shape
    if N < 1:
        raise ValueError("empty bag (N must be >= 1)")

    # Big tiles amortize per-grid-step overhead; clamp to the bag size.
    tile = max(LANE, min(tile_n, _round_up(N, LANE)))
    n_tiles = pl.cdiv(N, tile)

    kernel = _make_mil_kernel(n_true=N, tile_n=tile, ep=Ep, dp=Dp)
    const_spec = lambda w: pl.BlockSpec(w.shape, lambda i: (0, 0))

    grid_spec = pltpu.PrefetchScalarGridSpec(
        num_scalar_prefetch=0,
        grid=(n_tiles,),
        in_specs=[pl.BlockSpec((tile, F), lambda i: (i, 0))]
                 + [const_spec(w) for w in weights],
        out_specs=(pl.BlockSpec((1, Kp), lambda i: (0, 0)),
                   pl.BlockSpec((1, Ep), lambda i: (0, 0))),
        scratch_shapes=[pltpu.VMEM((Kp, 1), jnp.float32),    # running max
                        pltpu.VMEM((Kp, 1), jnp.float32),    # running denom
                        pltpu.VMEM((Kp, Ep), jnp.float32)])  # running wsi acc

    flops = 2 * N * (F * (Ep + Dp) + Dp * Kp + Kp * Ep) \
        + 2 * Kp * Ep * Ep + 2 * Ep * Kp
    bytes_accessed = int(conv_layers_out.size) * conv_layers_out.dtype.itemsize \
        + sum(int(w.size) * w.dtype.itemsize for w in weights) + 4 * (Kp + Ep)
    cost = pl.CostEstimate(flops=int(flops),
                           transcendentals=int(N * (Dp + Kp)),
                           bytes_accessed=int(bytes_accessed))

    y_pad, feat_pad = pl.pallas_call(
        kernel,
        grid_spec=grid_spec,
        out_shape=(jax.ShapeDtypeStruct((1, Kp), jnp.float32),
                   jax.ShapeDtypeStruct((1, Ep), jnp.float32)),
        compiler_params=pltpu.CompilerParams(
            dimension_semantics=("arbitrary",)),       # bag axis is a reduction
        cost_estimate=cost,
    )(conv_layers_out, *weights)

    # torch.squeeze on the (1, K) logits -> (K,); slice off lane padding.
    return y_pad[0, :K], feat_pad[:, :E]


def make_params(key, F, E, D, K):
    """Deterministic synthetic weights, stored transposed ((in, out)) so every
    matmul in both the reference and the kernel is a plain row-major dot."""
    ks = jax.random.split(key, 10)
    s = 0.05
    return dict(
        w_emb=jax.random.normal(ks[0], (F, E), jnp.float32) * s,
        b_emb=jax.random.normal(ks[1], (1, E), jnp.float32) * s,
        w_a1=jax.random.normal(ks[2], (E, D), jnp.float32) * s,
        b_a1=jax.random.normal(ks[3], (1, D), jnp.float32) * s,
        w_a2=jax.random.normal(ks[4], (D, K), jnp.float32) * s,
        b_a2=jax.random.normal(ks[5], (1, K), jnp.float32) * s,
        # embedding_before_fc: torch weight (E, K*E); stored as W.T (K*E, E),
        # row index k*E + e to match torch's .view(-1, E*K) flattening order.
        w_bef=jax.random.normal(ks[6], (K * E, E), jnp.float32) * s,
        b_bef=jax.random.normal(ks[7], (1, E), jnp.float32) * s,
        w_fc=jax.random.normal(ks[8], (E, K), jnp.float32) * s,
        b_fc=jax.random.normal(ks[9], (1, K), jnp.float32) * s,
    )


def mil_reference(conv_layers_out, params):
    """Pure-f32 JAX reference mirroring the PyTorch forward (x=None path)."""
    emb = conv_layers_out @ params["w_emb"] + params["b_emb"]
    h = jnp.tanh(emb @ params["w_a1"] + params["b_a1"])
    a = h @ params["w_a2"] + params["b_a2"]
    attn = jax.nn.softmax(a.T, axis=1)                 # (K, N) softmax over bag
    wsi = attn @ emb                                   # (K, E)
    K, E = wsi.shape
    flat = wsi.reshape(1, K * E)
    cls = jnp.maximum(flat @ params["w_bef"] + params["b_bef"], 0.0)
    y = cls @ params["w_fc"] + params["b_fc"]
    return jnp.squeeze(y), cls


if __name__ == "__main__":
    # Small bag: 200 patches x 256 features, hidden_space_len 32, 4 classes.
    # N is deliberately NOT a multiple of the tile to exercise the tail mask.
    N, F, E, D, K = 200, 256, 32, 32, 4
    key = jax.random.PRNGKey(0)
    k_feat, k_param = jax.random.split(key)
    conv_layers_out = jax.random.normal(k_feat, (N, F), jnp.float32)
    params = make_params(k_param, F, E, D, K)

    # Prepare / pad weights ONCE per model; jit the forward so the pallas_call
    # is compiled once and feats are consumed straight from f32 HBM.
    prepared = prepare_kernel_params(params, F, E, D, K)
    forward = jax.jit(functools.partial(mil_forward, prepared=prepared))

    y_prob, features_image = forward(conv_layers_out)
    jax.block_until_ready((y_prob, features_image))

    y_ref, feat_ref = mil_reference(conv_layers_out, params)
    assert y_prob.shape == (K,) and features_image.shape == (1, E)
    # bf16 MXU operands (incl. the fused W_emb@W_a1 weight) vs the f32 torch
    # reference: intentional precision trade, validated at bf16-level tolerance.
    assert jnp.allclose(y_prob, y_ref, atol=2e-3, rtol=2e-2)
    assert jnp.allclose(features_image, feat_ref, atol=2e-3, rtol=2e-2)
    print("KERNEL_OK")
</pallas_src>

<mosaic_0001>
module attributes {stable_mosaic.version = 11 : i64} {
  func.func @kernel(%arg0: i32, %arg1: memref<256x256xf32, #tpu.memory_space<vmem>>, %arg2: memref<256x256xbf16, #tpu.memory_space<vmem>>, %arg3: memref<1x256xf32, #tpu.memory_space<vmem>>, %arg4: memref<8x128xbf16, #tpu.memory_space<vmem>>, %arg5: memref<8x1xf32, #tpu.memory_space<vmem>>, %arg6: memref<1024x128xbf16, #tpu.memory_space<vmem>>, %arg7: memref<1x128xf32, #tpu.memory_space<vmem>>, %arg8: memref<128x8xf32, #tpu.memory_space<vmem>>, %arg9: memref<1x8xf32, #tpu.memory_space<vmem>>, %arg10: memref<1x8xf32, #tpu.memory_space<vmem>>, %arg11: memref<1x128xf32, #tpu.memory_space<vmem>>, %arg12: memref<8x1xf32, #tpu.memory_space<vmem>>, %arg13: memref<8x1xf32, #tpu.memory_space<vmem>>, %arg14: memref<8x128xf32, #tpu.memory_space<vmem>>) attributes {dimension_semantics = [#tpu.dimension_semantics<arbitrary>], iteration_bounds = array<i64: 1>, scalar_prefetch = 0 : i64, scratch_operands = 3 : i64, tpu.core_type = #tpu.core_type<tc>, window_params = [{transform_indices = @transform_0, window_bounds = array<i64: 256, 256>}, {pipeline_mode = #tpu.pipeline_mode<synchronous>, transform_indices = @transform_1, window_bounds = array<i64: 256, 256>}, {pipeline_mode = #tpu.pipeline_mode<synchronous>, transform_indices = @transform_2, window_bounds = array<i64: 1, 256>}, {pipeline_mode = #tpu.pipeline_mode<synchronous>, transform_indices = @transform_3, window_bounds = array<i64: 8, 128>}, {pipeline_mode = #tpu.pipeline_mode<synchronous>, transform_indices = @transform_4, window_bounds = array<i64: 8, 1>}, {pipeline_mode = #tpu.pipeline_mode<synchronous>, transform_indices = @transform_5, window_bounds = array<i64: 1024, 128>}, {pipeline_mode = #tpu.pipeline_mode<synchronous>, transform_indices = @transform_6, window_bounds = array<i64: 1, 128>}, {pipeline_mode = #tpu.pipeline_mode<synchronous>, transform_indices = @transform_7, window_bounds = array<i64: 128, 8>}, {pipeline_mode = #tpu.pipeline_mode<synchronous>, transform_indices = @transform_8, window_bounds = array<i64: 1, 8>}, {pipeline_mode = #tpu.pipeline_mode<synchronous>, transform_indices = @transform_9, window_bounds = array<i64: 1, 8>}, {pipeline_mode = #tpu.pipeline_mode<synchronous>, transform_indices = @transform_10, window_bounds = array<i64: 1, 128>}]} {
    %c0_i32 = arith.constant 0 : i32
    %0 = arith.cmpi eq, %arg0, %c0_i32 : i32
    %1 = arith.extui %0 : i1 to i32
    %c0_i32_0 = arith.constant 0 : i32
    %2 = arith.cmpi ne, %1, %c0_i32_0 : i32
    scf.if %2 {
      %cst_30 = arith.constant 0xFF800000 : f32
      %62 = vector.broadcast %cst_30 : f32 to vector<8x1xf32>
      %c0_31 = arith.constant 0 : index
      %c0_32 = arith.constant 0 : index
      %63 = vector.load %arg12[%c0_31, %c0_32] : memref<8x1xf32, #tpu.memory_space<vmem>>, vector<8x1xf32>
      tpu.vector_store %arg12[%c0_31, %c0_32], %62 {strides = array<i32>} : memref<8x1xf32, #tpu.memory_space<vmem>>, vector<8x1xf32>,
      %cst_33 = arith.constant 0.000000e+00 : f32
      %64 = vector.broadcast %cst_33 : f32 to vector<8x1xf32>
      %c0_34 = arith.constant 0 : index
      %c0_35 = arith.constant 0 : index
      %65 = vector.load %arg13[%c0_34, %c0_35] : memref<8x1xf32, #tpu.memory_space<vmem>>, vector<8x1xf32>
      tpu.vector_store %arg13[%c0_34, %c0_35], %64 {strides = array<i32>} : memref<8x1xf32, #tpu.memory_space<vmem>>, vector<8x1xf32>,
      %cst_36 = arith.constant 0.000000e+00 : f32
      %66 = vector.broadcast %cst_36 : f32 to vector<8x128xf32>
      %c0_37 = arith.constant 0 : index
      %c0_38 = arith.constant 0 : index
      %67 = vector.load %arg14[%c0_37, %c0_38] : memref<8x128xf32, #tpu.memory_space<vmem>>, vector<8x128xf32>
      tpu.vector_store %arg14[%c0_37, %c0_38], %66 {strides = array<i32>} : memref<8x128xf32, #tpu.memory_space<vmem>>, vector<8x128xf32>,
    } else {
    }
    %c0 = arith.constant 0 : index
    %c0_1 = arith.constant 0 : index
    %3 = vector.load %arg1[%c0, %c0_1] : memref<256x256xf32, #tpu.memory_space<vmem>>, vector<256x256xf32>
    %4 = arith.truncf %3 : vector<256x256xf32> to vector<256x256xbf16>
    %c0_2 = arith.constant 0 : index
    %c0_3 = arith.constant 0 : index
    %5 = vector.load %arg2[%c0_2, %c0_3] : memref<256x256xbf16, #tpu.memory_space<vmem>>, vector<256x256xbf16>
    %cst = arith.constant dense<0.000000e+00> : vector<256x256xf32>
    %6 = tpu.matmul %4, %5, %cst {dimension_numbers = #tpu.dot_dimension_numbers<[1], [0], [0], [1], [0, 0, 1, 1], [], []>} : vector<256x256xbf16>, vector<256x256xbf16>, vector<256x256xf32> -> vector<256x256xf32>
    %c0_4 = arith.constant 0 : index
    %c0_5 = arith.constant 0 : index
    %7 = vector.load %arg3[%c0_4, %c0_5] : memref<1x256xf32, #tpu.memory_space<vmem>>, vector<1x256xf32>
    %8 = vector.broadcast %7 : vector<1x256xf32> to vector<256x256xf32>
    %9 = arith.addf %6, %8 : vector<256x256xf32>
    %10 = vector.extract_strided_slice %9 {offsets = [0, 0], sizes = [256, 128], strides = [1, 1]} : vector<256x256xf32> to vector<256x128xf32>
    %11 = vector.extract_strided_slice %9 {offsets = [0, 128], sizes = [256, 128], strides = [1, 1]} : vector<256x256xf32> to vector<256x128xf32>
    %12 = math.tanh %11 : vector<256x128xf32>
    %c256_i32 = arith.constant 256 : i32
    %13 = arith.muli %arg0, %c256_i32 : i32
    %c200_i32 = arith.constant 200 : i32
    %14 = arith.subi %c200_i32, %13 : i32
    %15 = tpu.iota {dimensions = array<i32: 0>} : vector<256x1xi32>
    %16 = vector.broadcast %14 : i32 to vector<256x1xi32>
    %17 = arith.cmpi slt, %15, %16 : vector<256x1xi32>
    %18 = tpu.iota {dimensions = array<i32: 1>} : vector<1x256xi32>
    %19 = vector.broadcast %14 : i32 to vector<1x256xi32>
    %20 = arith.cmpi slt, %18, %19 : vector<1x256xi32>
    %cst_6 = arith.constant 0.000000e+00 : f32
    %21 = vector.shape_cast %17 : vector<256x1xi1> to vector<256x1xi1>
    %22 = vector.broadcast %21 : vector<256x1xi1> to vector<256x128xi1>
    %23 = vector.broadcast %cst_6 : f32 to vector<256x128xf32>
    %24 = arith.select %22, %10, %23 : vector<256x128xi1>, vector<256x128xf32>
    %c0_7 = arith.constant 0 : index
    %c0_8 = arith.constant 0 : index
    %25 = vector.load %arg4[%c0_7, %c0_8] : memref<8x128xbf16, #tpu.memory_space<vmem>>, vector<8x128xbf16>
    %26 = arith.truncf %12 : vector<256x128xf32> to vector<256x128xbf16>
    %cst_9 = arith.constant dense<0.000000e+00> : vector<8x256xf32>
    %27 = tpu.matmul %25, %26, %cst_9 {dimension_numbers = #tpu.dot_dimension_numbers<[1], [1], [0], [0], [0, 0, 1, 0], [], []>} : vector<8x128xbf16>, vector<256x128xbf16>, vector<8x256xf32> -> vector<8x256xf32>
    %c0_10 = arith.constant 0 : index
    %c0_11 = arith.constant 0 : index
    %28 = vector.load %arg5[%c0_10, %c0_11] : memref<8x1xf32, #tpu.memory_space<vmem>>, vector<8x1xf32>
    %29 = vector.broadcast %28 : vector<8x1xf32> to vector<8x256xf32>
    %30 = arith.addf %27, %29 : vector<8x256xf32>
    %cst_12 = arith.constant -1.000000e+30 : f32
    %31 = vector.shape_cast %20 : vector<1x256xi1> to vector<1x256xi1>
    %32 = vector.broadcast %31 : vector<1x256xi1> to vector<8x256xi1>
    %33 = vector.broadcast %cst_12 : f32 to vector<8x256xf32>
    %34 = arith.select %32, %30, %33 : vector<8x256xi1>, vector<8x256xf32>
    %c0_13 = arith.constant 0 : index
    %c0_14 = arith.constant 0 : index
    %35 = vector.load %arg12[%c0_13, %c0_14] : memref<8x1xf32, #tpu.memory_space<vmem>>, vector<8x1xf32>
    %cst_15 = arith.constant dense<0xFF800000> : vector<8xf32>
    %36 = vector.multi_reduction <maximumf>, %34, %cst_15 [1] : vector<8x256xf32> to vector<8xf32>
    %37 = vector.shape_cast %36 : vector<8xf32> to vector<8x1xf32>
    %38 = arith.maximumf %35, %37 : vector<8x1xf32>
    %39 = arith.subf %35, %38 : vector<8x1xf32>
    %40 = math.exp %39 : vector<8x1xf32>
    %41 = vector.broadcast %38 : vector<8x1xf32> to vector<8x256xf32>
    %42 = arith.subf %34, %41 : vector<8x256xf32>
    %43 = math.exp %42 : vector<8x256xf32>
    %c0_16 = arith.constant 0 : index
    %c0_17 = arith.constant 0 : index
    %44 = vector.load %arg13[%c0_16, %c0_17] : memref<8x1xf32, #tpu.memory_space<vmem>>, vector<8x1xf32>
    %45 = arith.mulf %40, %44 : vector<8x1xf32>
    %cst_18 = arith.constant dense<0.000000e+00> : vector<8xf32>
    %46 = vector.multi_reduction <add>, %43, %cst_18 [1] : vector<8x256xf32> to vector<8xf32>
    %47 = vector.shape_cast %46 : vector<8xf32> to vector<8x1xf32>
    %48 = arith.addf %45, %47 : vector<8x1xf32>
    %c0_19 = arith.constant 0 : index
    %c0_20 = arith.constant 0 : index
    %49 = vector.load %arg13[%c0_19, %c0_20] : memref<8x1xf32, #tpu.memory_space<vmem>>, vector<8x1xf32>
    tpu.vector_store %arg13[%c0_19, %c0_20], %48 {strides = array<i32>} : memref<8x1xf32, #tpu.memory_space<vmem>>, vector<8x1xf32>,
    %c0_21 = arith.constant 0 : index
    %c0_22 = arith.constant 0 : index
    %50 = vector.load %arg14[%c0_21, %c0_22] : memref<8x128xf32, #tpu.memory_space<vmem>>, vector<8x128xf32>
    %51 = vector.broadcast %40 : vector<8x1xf32> to vector<8x128xf32>
    %52 = arith.mulf %50, %51 : vector<8x128xf32>
    %53 = arith.truncf %43 : vector<8x256xf32> to vector<8x256xbf16>
    %54 = arith.truncf %24 : vector<256x128xf32> to vector<256x128xbf16>
    %cst_23 = arith.constant dense<0.000000e+00> : vector<8x128xf32>
    %55 = tpu.matmul %53, %54, %cst_23 {dimension_numbers = #tpu.dot_dimension_numbers<[1], [0], [0], [1], [0, 0, 1, 1], [], []>} : vector<8x256xbf16>, vector<256x128xbf16>, vector<8x128xf32> -> vector<8x128xf32>
    %56 = arith.addf %52, %55 : vector<8x128xf32>
    %c0_24 = arith.constant 0 : index
    %c0_25 = arith.constant 0 : index
    %57 = vector.load %arg14[%c0_24, %c0_25] : memref<8x128xf32, #tpu.memory_space<vmem>>, vector<8x128xf32>
    tpu.vector_store %arg14[%c0_24, %c0_25], %56 {strides = array<i32>} : memref<8x128xf32, #tpu.memory_space<vmem>>, vector<8x128xf32>,
    %c0_26 = arith.constant 0 : index
    %c0_27 = arith.constant 0 : index
    %58 = vector.load %arg12[%c0_26, %c0_27] : memref<8x1xf32, #tpu.memory_space<vmem>>, vector<8x1xf32>
    tpu.vector_store %arg12[%c0_26, %c0_27], %38 {strides = array<i32>} : memref<8x1xf32, #tpu.memory_space<vmem>>, vector<8x1xf32>,
    %c0_i32_28 = arith.constant 0 : i32
    %59 = arith.cmpi eq, %arg0, %c0_i32_28 : i32
    %60 = arith.extui %59 : i1 to i32
    %c0_i32_29 = arith.constant 0 : i32
    %61 = arith.cmpi ne, %60, %c0_i32_29 : i32
    scf.if %61 {
      %c0_30 = arith.constant 0 : index
      %c0_31 = arith.constant 0 : index
      %62 = vector.load %arg13[%c0_30, %c0_31] : memref<8x1xf32, #tpu.memory_space<vmem>>, vector<8x1xf32>
      %63 = tpu.reciprocal %62 : vector<8x1xf32> -> vector<8x1xf32>
      %c0_32 = arith.constant 0 : index
      %c0_33 = arith.constant 0 : index
      %64 = vector.load %arg14[%c0_32, %c0_33] : memref<8x128xf32, #tpu.memory_space<vmem>>, vector<8x128xf32>
      %65 = vector.broadcast %63 : vector<8x1xf32> to vector<8x128xf32>
      %66 = arith.mulf %64, %65 : vector<8x128xf32>
      %67 = vector.shape_cast %66 : vector<8x128xf32> to vector<1x1024xf32>
      %68 = arith.truncf %67 : vector<1x1024xf32> to vector<1x1024xbf16>
      %c0_34 = arith.constant 0 : index
      %c0_35 = arith.constant 0 : index
      %69 = vector.load %arg6[%c0_34, %c0_35] : memref<1024x128xbf16, #tpu.memory_space<vmem>>, vector<1024x128xbf16>
      %cst_36 = arith.constant dense<0.000000e+00> : vector<1x128xf32>
      %70 = tpu.matmul %68, %69, %cst_36 {dimension_numbers = #tpu.dot_dimension_numbers<[1], [0], [0], [1], [0, 0, 1, 1], [], []>} : vector<1x1024xbf16>, vector<1024x128xbf16>, vector<1x128xf32> -> vector<1x128xf32>
      %c0_37 = arith.constant 0 : index
      %c0_38 = arith.constant 0 : index
      %71 = vector.load %arg7[%c0_37, %c0_38] : memref<1x128xf32, #tpu.memory_space<vmem>>, vector<1x128xf32>
      %72 = arith.addf %70, %71 : vector<1x128xf32>
      %cst_39 = arith.constant 0.000000e+00 : f32
      %73 = vector.broadcast %cst_39 : f32 to vector<1x128xf32>
      %74 = arith.maximumf %72, %73 : vector<1x128xf32>
      %c0_40 = arith.constant 0 : index
      %c0_41 = arith.constant 0 : index
      %75 = vector.load %arg11[%c0_40, %c0_41] : memref<1x128xf32, #tpu.memory_space<vmem>>, vector<1x128xf32>
      tpu.vector_store %arg11[%c0_40, %c0_41], %74 {strides = array<i32>} : memref<1x128xf32, #tpu.memory_space<vmem>>, vector<1x128xf32>,
      %c0_42 = arith.constant 0 : index
      %c0_43 = arith.constant 0 : index
      %76 = vector.load %arg8[%c0_42, %c0_43] : memref<128x8xf32, #tpu.memory_space<vmem>>, vector<128x8xf32>
      %cst_44 = arith.constant dense<0.000000e+00> : vector<1x8xf32>
      %77 = tpu.matmul %74, %76, %cst_44 {dimension_numbers = #tpu.dot_dimension_numbers<[1], [0], [0], [1], [0, 0, 1, 1], [], []>} : vector<1x128xf32>, vector<128x8xf32>, vector<1x8xf32> -> vector<1x8xf32>
      %c0_45 = arith.constant 0 : index
      %c0_46 = arith.constant 0 : index
      %78 = vector.load %arg9[%c0_45, %c0_46] : memref<1x8xf32, #tpu.memory_space<vmem>>, vector<1x8xf32>
      %79 = arith.addf %77, %78 : vector<1x8xf32>
      %c0_47 = arith.constant 0 : index
      %c0_48 = arith.constant 0 : index
      %80 = vector.load %arg10[%c0_47, %c0_48] : memref<1x8xf32, #tpu.memory_space<vmem>>, vector<1x8xf32>
      tpu.vector_store %arg10[%c0_47, %c0_48], %79 {strides = array<i32>} : memref<1x8xf32, #tpu.memory_space<vmem>>, vector<1x8xf32>,
    } else {
    }
    return
  }
  func.func @transform_0(%arg0: i32) -> (i32, i32) {
    %c0_i32 = arith.constant 0 : i32
    %c0_i32_0 = arith.constant 0 : i32
    return %arg0, %c0_i32 : i32, i32
  }
  func.func @transform_1(%arg0: i32) -> (i32, i32) {
    %c0_i32 = arith.constant 0 : i32
    %c0_i32_0 = arith.constant 0 : i32
    %c0_i32_1 = arith.constant 0 : i32
    return %c0_i32, %c0_i32_0 : i32, i32
  }
  func.func @transform_2(%arg0: i32) -> (i32, i32) {
    %c0_i32 = arith.constant 0 : i32
    %c0_i32_0 = arith.constant 0 : i32
    %c0_i32_1 = arith.constant 0 : i32
    return %c0_i32, %c0_i32_0 : i32, i32
  }
  func.func @transform_3(%arg0: i32) -> (i32, i32) {
    %c0_i32 = arith.constant 0 : i32
    %c0_i32_0 = arith.constant 0 : i32
    %c0_i32_1 = arith.constant 0 : i32
    return %c0_i32, %c0_i32_0 : i32, i32
  }
  func.func @transform_4(%arg0: i32) -> (i32, i32) {
    %c0_i32 = arith.constant 0 : i32
    %c0_i32_0 = arith.constant 0 : i32
    %c0_i32_1 = arith.constant 0 : i32
    return %c0_i32, %c0_i32_0 : i32, i32
  }
  func.func @transform_5(%arg0: i32) -> (i32, i32) {
    %c0_i32 = arith.constant 0 : i32
    %c0_i32_0 = arith.constant 0 : i32
    %c0_i32_1 = arith.constant 0 : i32
    return %c0_i32, %c0_i32_0 : i32, i32
  }
  func.func @transform_6(%arg0: i32) -> (i32, i32) {
    %c0_i32 = arith.constant 0 : i32
    %c0_i32_0 = arith.constant 0 : i32
    %c0_i32_1 = arith.constant 0 : i32
    return %c0_i32, %c0_i32_0 : i32, i32
  }
  func.func @transform_7(%arg0: i32) -> (i32, i32) {
    %c0_i32 = arith.constant 0 : i32
    %c0_i32_0 = arith.constant 0 : i32
    %c0_i32_1 = arith.constant 0 : i32
    return %c0_i32, %c0_i32_0 : i32, i32
  }
  func.func @transform_8(%arg0: i32) -> (i32, i32) {
    %c0_i32 = arith.constant 0 : i32
    %c0_i32_0 = arith.constant 0 : i32
    %c0_i32_1 = arith.constant 0 : i32
    return %c0_i32, %c0_i32_0 : i32, i32
  }
  func.func @transform_9(%arg0: i32) -> (i32, i32) {
    %c0_i32 = arith.constant 0 : i32
    %c0_i32_0 = arith.constant 0 : i32
    %c0_i32_1 = arith.constant 0 : i32
    return %c0_i32, %c0_i32_0 : i32, i32
  }
  func.func @transform_10(%arg0: i32) -> (i32, i32) {
    %c0_i32 = arith.constant 0 : i32
    %c0_i32_0 = arith.constant 0 : i32
    %c0_i32_1 = arith.constant 0 : i32
    return %c0_i32, %c0_i32_0 : i32, i32
  }
}

</mosaic_0001>

<bundles_post_ra>
// kernel: mil_forward.1
= control target key start
LH: loop header
LB: loop body
LE: loop exit
PB: predicated region body
PF: predicated region fallthrough
CT: control target
= control target key end

     0   :  { %16 = vsyncpa [#allocation6], 0  ;;  %s2887_s0 = inlined_call_operand.hbm [shape: f32[200,256], index: 0, kind: input, shape index: {}]   ;;  %s2888_s1 = inlined_call_operand.hbm [shape: bf16[256,256], index: 1, kind: input, shape index: {}]   ;;  %s2889_s2 = inlined_call_operand.hbm [shape: f32[1,256], index: 2, kind: input, shape index: {}]   ;;  %s2890_s3 = inlined_call_operand.vmem [shape: bf16[8,128], index: 3, kind: input, shape index: {}]   ;;  %s2891_s4 = inlined_call_operand.hbm [shape: f32[8,1], index: 4, kind: input, shape index: {}]   ;;  %s2892_s5 = inlined_call_operand.hbm [shape: bf16[1024,128], index: 5, kind: input, shape index: {}]   ;;  %s2893_s6 = inlined_call_operand.vmem [shape: f32[1,128], index: 6, kind: input, shape index: {}]   ;;  %s2894_s7 = inlined_call_operand.hbm [shape: f32[128,8], index: 7, kind: input, shape index: {}]   ;;  %s2895_s8 = inlined_call_operand.vmem [shape: f32[1,8], index: 8, kind: input, shape index: {}]   ;;  %s2896_s9 = inlined_call_operand.vmem [shape: f32[1,8], index: 9, kind: output, shape index: {0}]   ;;  %s2897_s10 = inlined_call_operand.hbm [shape: f32[1,128], index: 10, kind: output, shape index: {1}]  }
   0x1   :  { %17 = vsyncpa [#allocation9], 0 }
   0x2   :  { %18 = vsyncpa [#allocation12], 0 }
   0x3   :  { %19 = vsyncpa [#allocation15], 0 }
   0x4   :  { %20 = vsyncpa [#allocation7], 0 }
   0x5   :  { %25 = vsyncadd [#allocation6], 1792  ;;  %s2435_s13 = smov [#allocation8]  }
   0x6   :  { %s38_s14 = sshll.u32 %s2435_s13, 4  ;;  %s39_s14 = int_to_ptr.vmem [resolvable:$true] %s38_s14 }
   0x7   :  { %s2293_s15 = scalar_lea.vmem %s39_s14, 4096  ;;  %p2298_p1 = scmp.lt.s32.totalorder %s39_s14, %s39_s14 }
   0x8   :  { %p2294_p0 = scmp.ne.s32.totalorder %s39_s14, %s2293_s15  ;;  %p2299_p2 = scmp.lt.s32.totalorder %s2293_s15, %s2293_s15 }
   0xa   :  { %p2300_p3 = por %p2299_p2, %p2298_p1 }
   0xc   :  { %p2301_p4 = pnand %p2300_p3, %p2294_p0 }
   0xe   :  { %2304 = shalt.err (!%p2301_p4)
}
   0xf   :  { %s2436_s16 = smov 128   ;;  %s2437_s17 = smov 8  }
  0x10   :  { %44 = dma.hbm_to_vmem [thread:$0]  %s2888_s1, 4096, %s39_s14, [#allocation9], %s2436_s16, %s2436_s16, %s2437_s17  }
  0x11   :  { %s2438_s20 = smov [#allocation11]   ;;  %s2439_s22 = smov [#allocation5]  }
  0x12   :  { %s63_s21 = sshll.u32 %s2438_s20, 4  ;;  %s26_s23 = sshll.u32 %s2439_s22, 4  ;;  %s64_s21 = int_to_ptr.vmem [resolvable:$true] %s63_s21  ;;  %s27_s23 = int_to_ptr.vmem [resolvable:$true] %s26_s23 }
  0x13   :  { %s2313_s24 = scalar_lea.vmem %s64_s21, 128  ;;  %p2318_p6 = scmp.lt.s32.totalorder %s64_s21, %s64_s21 }
  0x14   :  { %p2314_p5 = scmp.ne.s32.totalorder %s64_s21, %s2313_s24  ;;  %p2319_p7 = scmp.lt.s32.totalorder %s2313_s24, %s2313_s24 }
  0x16   :  { %p2320_p8 = por %p2319_p7, %p2318_p6 }
  0x18   :  { %p2321_p9 = pnand %p2320_p8, %p2314_p5 }
  0x1a   :  { %2324 = shalt.err (!%p2321_p9)
}
  0x1b   :  { %66 = dma.hbm_to_vmem [thread:$0]  %s2891_s4, 128, %s64_s21, [#allocation12]  }
  0x1c   :  { %s2333_s27 = scalar_lea.vmem %s27_s23, 6400  ;;  %s2337_s1 = scalar_lea.vmem %s27_s23, 8192 }
  0x1d   :  { %p2334_p10 = scmp.ne.s32.totalorder %s27_s23, %s2333_s27  ;;  %p2338_p11 = scmp.lt.s32.totalorder %s27_s23, %s27_s23 }
  0x1e   :  { %p2339_p12 = scmp.lt.s32.totalorder %s2337_s1, %s2333_s27 }
  0x20   :  { %p2340_p13 = por %p2339_p12, %p2338_p11 }
  0x22   :  { %p2341_p0 = pnand %p2340_p13, %p2334_p10 }
  0x24   :  { %2344 = shalt.err (!%p2341_p0)
}
  0x25   :  { %s2440_s28 = smov 256   ;;  %s2441_s29 = smov 16  }
  0x26   :  { %32 = dma.hbm_to_vmem [thread:$0]  %s2887_s0, 6400, %s27_s23, [#allocation6], %s2440_s28, %s2440_s28, %s2441_s29  }
  0x27   :  { %s2442_s12 = smov [#allocation10]   ;;  %s2443_s14 = smov [#allocation13]  }
  0x28   :  { %s51_s13 = sshll.u32 %s2442_s12, 4  ;;  %s72_s4 = sshll.u32 %s2443_s14, 4  ;;  %s52_s13 = int_to_ptr.vmem [resolvable:$true] %s51_s13  ;;  %s73_s4 = int_to_ptr.vmem [resolvable:$true] %s72_s4 }
  0x29   :  { %s2353_s15 = scalar_lea.vmem %s52_s13, 32  ;;  %p2358_p2 = scmp.lt.s32.totalorder %s52_s13, %s52_s13 }
  0x2a   :  { %p2354_p1 = scmp.ne.s32.totalorder %s52_s13, %s2353_s15  ;;  %p2359_p3 = scmp.lt.s32.totalorder %s2353_s15, %s2353_s15 }
  0x2c   :  { %p2360_p4 = por %p2359_p3, %p2358_p2 }
  0x2e   :  { %p2361_p5 = pnand %p2360_p4, %p2354_p1 }
  0x30   :  { %2364 = shalt.err (!%p2361_p5)
}
  0x31   :  { %54 = dma.hbm_to_vmem [thread:$0]  %s2889_s2, 32, %s52_s13, [#allocation9]  }
  0x32   :  { %s2373_s20 = scalar_lea.vmem %s73_s4, 8192  ;;  %p2378_p7 = scmp.lt.s32.totalorder %s73_s4, %s73_s4 }
  0x33   :  { %p2374_p6 = scmp.ne.s32.totalorder %s73_s4, %s2373_s20  ;;  %p2379_p8 = scmp.lt.s32.totalorder %s2373_s20, %s2373_s20 }
  0x35   :  { %p2380_p9 = por %p2379_p8, %p2378_p7 }
  0x37   :  { %p2381_p10 = pnand %p2380_p9, %p2374_p6 }
  0x39   :  { %2384 = shalt.err (!%p2381_p10)
}
  0x3a   :  { %s2444_s0 = smov 64   ;;  %s2445_s21 = smov 4  }
  0x3b   :  { %78 = dma.hbm_to_vmem [thread:$0]  %s2892_s5, 8192, %s73_s4, [#allocation12], %s2444_s0, %s2444_s0, %s2445_s21  }
  0x3c   :  { %s2446_s24 = smov [#allocation14]  }
  0x3d   :  { %s86_s25 = sshll.u32 %s2446_s24, 4  ;;  %s87_s25 = int_to_ptr.vmem [resolvable:$true] %s86_s25 }
  0x3e   :  { %s2393_s26 = scalar_lea.vmem %s87_s25, 2048  ;;  %p2398_p12 = scmp.lt.s32.totalorder %s87_s25, %s87_s25 }
  0x3f   :  { %p2394_p11 = scmp.ne.s32.totalorder %s87_s25, %s2393_s26  ;;  %p2399_p13 = scmp.lt.s32.totalorder %s2393_s26, %s2393_s26 }
  0x41   :  { %p2400_p0 = por %p2399_p13, %p2398_p12 }
  0x43   :  { %p2401_p1 = pnand %p2400_p0, %p2394_p11 }
  0x45   :  { %2404 = shalt.err (!%p2401_p1)
}
  0x46   :  { %92 = dma.hbm_to_vmem [thread:$0]  %s2894_s7, 2048, %s87_s25, [#allocation15], %s2436_s16, %s2436_s16, %s2437_s17  }
  0x47   :  { %2425 = dma.done.wait [#allocation6], 8192  }
  0x48   :  { %2426 = vsyncadd [#allocation6], 4294959104 }
  0x49   :  { %2427 = dma.done.wait [#allocation9], 4128  }
  0x4a   :  { %2428 = vsyncadd [#allocation9], 4294963168 }
  0x4b   :  { %2429 = dma.done.wait [#allocation12], 8320  }
  0x4c   :  { %2430 = vsyncadd [#allocation12], 4294958976 }
  0x4d   :  { %2431 = dma.done.wait [#allocation15], 2048  }
  0x4e   :  { %2432 = vsyncadd [#allocation15], 4294965248  ;;  %v2101_v0 = vld [vmem:[#allocation8 + $0x74] ss:$8 sps:$4 sm:$0xff]   ;;  %v2103_v1 = vld [vmem:[#allocation8 + $0x70] ss:$8 sps:$4 sm:$0xff]  }
  0x4f   :  { %422 = vmatprep.subr.bf16.mxu0 %v2101_v0  ;;  %v2104_v2 = vld [vmem:[#allocation8 + $0x64] ss:$8 sps:$4 sm:$0xff]   ;;  %v2106_v3 = vld [vmem:[#allocation8 + $0x60] ss:$8 sps:$4 sm:$0xff]   ;;  %v2107_v4 = vld [vmem:[#allocation8 + $0x54] ss:$8 sps:$4 sm:$0xff]  }
  0x50   :  { %423 = vmatpush1.bf16.msra.mxu0 %v2103_v1  ;;  %v2109_v5 = vld [vmem:[#allocation8 + $0x50] ss:$8 sps:$4 sm:$0xff]   ;;  %v2110_v6 = vld [vmem:[#allocation8 + $0x44] ss:$8 sps:$4 sm:$0xff]   ;;  %v2112_v7 = vld [vmem:[#allocation8 + $0x40] ss:$8 sps:$4 sm:$0xff]  }
  0x51   :  { %424 = vmatprep.subr.bf16.mxu0 %v2104_v2  ;;  %v2113_v8 = vld [vmem:[#allocation8 + $0x34] ss:$8 sps:$4 sm:$0xff]   ;;  %v2115_v9 = vld [vmem:[#allocation8 + $0x30] ss:$8 sps:$4 sm:$0xff]   ;;  %v2116_v10 = vld [vmem:[#allocation8 + $0x24] ss:$8 sps:$4 sm:$0xff]  }
  0x52   :  { %v2118_v11 = vld [vmem:[#allocation8 + $0x20] ss:$8 sps:$4 sm:$0xff]   ;;  %v2119_v12 = vld [vmem:[#allocation8 + $0x14] ss:$8 sps:$4 sm:$0xff]   ;;  %v2121_v16 = vld [vmem:[#allocation8 + $0x10] ss:$8 sps:$4 sm:$0xff]  }
  0x53   :  { %v123_v13 = vld [vmem:[#allocation5 + $0x8] sm:$0xff]  ;;  %v125_v14 = vld [vmem:[#allocation5 + $0x18] sm:$0xff]  ;;  %v122_v35 = vld [vmem:[#allocation5] sm:$0xff]  ;;  %vm118_vm0 = vcmask 7168   ;;  %vm2450_vm2 = vmmov 0   ;;  %s2451_s17 = smov [#allocation16]  }
  0x54   :  { %425 = vmatpush1.bf16.msra.mxu0 %v2106_v3  ;;  %v187_v15 = vpack.c.bf16 %v125_v14, %v123_v13  ;;  %v2122_v17 = vld [vmem:[#allocation8 + $0x4] ss:$8 sps:$4 sm:$0xff]   ;;  %v2124_v18 = vld [vmem:[#allocation8] ss:$8 sps:$4 sm:$0xff]   ;;  %v2125_v19 = vld [vmem:[#allocation8 + $0xf4] ss:$8 sps:$4 sm:$0xff]  }
  0x55   :  { %426 = vmatprep.subr.bf16.mxu0 %v2107_v4  ;;  %v2127_v20 = vld [vmem:[#allocation8 + $0xf0] ss:$8 sps:$4 sm:$0xff]   ;;  %v2128_v21 = vld [vmem:[#allocation8 + $0xe4] ss:$8 sps:$4 sm:$0xff]   ;;  %v2130_v22 = vld [vmem:[#allocation8 + $0xe0] ss:$8 sps:$4 sm:$0xff]  }
  0x56   :  { %454 = vmatprep.mubr.bf16.mxu0 %v187_v15  ;;  %v2131_v23 = vld [vmem:[#allocation8 + $0xd4] ss:$8 sps:$4 sm:$0xff]   ;;  %v2133_v24 = vld [vmem:[#allocation8 + $0xd0] ss:$8 sps:$4 sm:$0xff]   ;;  %v2134_v25 = vld [vmem:[#allocation8 + $0xc4] ss:$8 sps:$4 sm:$0xff]  }
  0x57   :  { %v2136_v26 = vld [vmem:[#allocation8 + $0xc0] ss:$8 sps:$4 sm:$0xff]   ;;  %v2137_v27 = vld [vmem:[#allocation8 + $0xb4] ss:$8 sps:$4 sm:$0xff]   ;;  %v2139_v28 = vld [vmem:[#allocation8 + $0xb0] ss:$8 sps:$4 sm:$0xff]  }
  0x58   :  { %427 = vmatpush1.bf16.msra.mxu0 %v2109_v5  ;;  %v2140_v29 = vld [vmem:[#allocation8 + $0xa4] ss:$8 sps:$4 sm:$0xff]   ;;  %v2142_v30 = vld [vmem:[#allocation8 + $0xa0] ss:$8 sps:$4 sm:$0xff]   ;;  %v2143_v31 = vld [vmem:[#allocation8 + $0x94] ss:$8 sps:$4 sm:$0xff]  }
  0x59   :  { %428 = vmatprep.subr.bf16.mxu0 %v2110_v6  ;;  %v2145_v32 = vld [vmem:[#allocation8 + $0x90] ss:$8 sps:$4 sm:$0xff]   ;;  %v2146_v33 = vld [vmem:[#allocation8 + $0x84] ss:$8 sps:$4 sm:$0xff]   ;;  %v2148_v34 = vld [vmem:[#allocation8 + $0x80] ss:$8 sps:$4 sm:$0xff]  }
  0x5a   :  { %v124_v36 = vld [vmem:[#allocation5 + $0x10] sm:$0xff]  ;;  %v127_v37 = vld [vmem:[#allocation5 + $0x28] sm:$0xff]  ;;  %v129_v38 = vld [vmem:[#allocation5 + $0x38] sm:$0xff]  ;;  %s1814_s1 = sshll.u32 %s2451_s17, 4  ;;  %s1815_s1 = int_to_ptr.vmem [resolvable:$true] %s1814_s1 }
  0x5b   :  { %v186_v39 = vpack.c.bf16 %v124_v36, %v122_v35  ;;  %v189_v40 = vpack.c.bf16 %v129_v38, %v127_v37  ;;  %v126_v41 = vld [vmem:[#allocation5 + $0x20] sm:$0xff]  ;;  %v128_v42 = vld [vmem:[#allocation5 + $0x30] sm:$0xff]  ;;  %v131_v43 = vld [vmem:[#allocation5 + $0x48] sm:$0xff]  ;;  %s2405_s28 = scalar_lea.vmem %s1815_s1, 16  ;;  %p2410_p3 = scmp.lt.s32.totalorder %s1815_s1, %s1815_s1 }
  0x5c   :  { %429 = vmatpush1.bf16.msra.mxu0 %v2112_v7  ;;  %v133_v44 = vld [vmem:[#allocation5 + $0x58] sm:$0xff]  ;;  %v188_v45 = vpack.c.bf16 %v128_v42, %v126_v41  ;;  %v130_v47 = vld [vmem:[#allocation5 + $0x40] sm:$0xff]  ;;  %v132_v48 = vld [vmem:[#allocation5 + $0x50] sm:$0xff]  ;;  %p2406_p2 = scmp.ne.s32.totalorder %s1815_s1, %s2405_s28 }
  0x5d   :  { %430 = vmatprep.subr.bf16.mxu0 %v2113_v8  ;;  %v191_v46 = vpack.c.bf16 %v133_v44, %v131_v43  ;;  %v135_v49 = vld [vmem:[#allocation5 + $0x68] sm:$0xff]  ;;  %v137_v50 = vld [vmem:[#allocation5 + $0x78] sm:$0xff]  ;;  %v190_v51 = vpack.c.bf16 %v132_v48, %v130_v47  ;;  %v134_v53 = vld [vmem:[#allocation5 + $0x60] sm:$0xff] }
  0x5e   :  { %v193_v52 = vpack.c.bf16 %v137_v50, %v135_v49  ;;  %v136_v54 = vld [vmem:[#allocation5 + $0x70] sm:$0xff]  ;;  %v139_v55 = vld [vmem:[#allocation5 + $0x88] sm:$0xff]  ;;  %v141_v56 = vld [vmem:[#allocation5 + $0x98] sm:$0xff] }
  0x5f   :  { %v192_v57 = vpack.c.bf16 %v136_v54, %v134_v53  ;;  %v195_v58 = vpack.c.bf16 %v141_v56, %v139_v55  ;;  %v138_v59 = vld [vmem:[#allocation5 + $0x80] sm:$0xff]  ;;  %v140_v60 = vld [vmem:[#allocation5 + $0x90] sm:$0xff]  ;;  %v143_v61 = vld [vmem:[#allocation5 + $0xa8] sm:$0xff] }
  0x60   :  { %431 = vmatpush1.bf16.msra.mxu0 %v2115_v9  ;;  %v145_v62 = vld [vmem:[#allocation5 + $0xb8] sm:$0xff]  ;;  %v194_v63 = vpack.c.bf16 %v140_v60, %v138_v59  ;;  %v142_v1 = vld [vmem:[#allocation5 + $0xa0] sm:$0xff]  ;;  %v144_v2 = vld [vmem:[#allocation5 + $0xb0] sm:$0xff] }
  0x61   :  { %432 = vmatprep.subr.bf16.mxu0 %v2116_v10  ;;  %v197_v0 = vpack.c.bf16 %v145_v62, %v143_v61  ;;  %v147_v3 = vld [vmem:[#allocation5 + $0xc8] sm:$0xff]  ;;  %v149_v4 = vld [vmem:[#allocation5 + $0xd8] sm:$0xff]  ;;  %v196_v5 = vpack.c.bf16 %v144_v2, %v142_v1  ;;  %v146_v7 = vld [vmem:[#allocation5 + $0xc0] sm:$0xff] }
  0x62   :  { %v199_v6 = vpack.c.bf16 %v149_v4, %v147_v3  ;;  %v148_v8 = vld [vmem:[#allocation5 + $0xd0] sm:$0xff]  ;;  %v151_v9 = vld [vmem:[#allocation5 + $0xe8] sm:$0xff]  ;;  %v153_v10 = vld [vmem:[#allocation5 + $0xf8] sm:$0xff] }
  0x63   :  { %v150_v13 = vld [vmem:[#allocation5 + $0xe0] sm:$0xff]  ;;  %v152_v14 = vld [vmem:[#allocation5 + $0xf0] sm:$0xff]  ;;  %v155_v15 = vld [vmem:[#allocation5 + $0x108] sm:$0xff] }
  0x64   :  { %433 = vmatpush1.bf16.msra.mxu0 %v2118_v11  ;;  %v198_v11 = vpack.c.bf16 %v148_v8, %v146_v7  ;;  %v166_v37 = vld [vmem:[#allocation5 + $0x160] sm:$0xff]  ;;  %v168_v38 = vld [vmem:[#allocation5 + $0x170] sm:$0xff] }
  0x65   :  { %434 = vmatprep.subr.bf16.mxu0 %v2119_v12  ;;  %v201_v12 = vpack.c.bf16 %v153_v10, %v151_v9  ;;  %v208_v41 = vpack.c.bf16 %v168_v38, %v166_v37  ;;  %v170_v43 = vld [vmem:[#allocation5 + $0x180] sm:$0xff]  ;;  %v172_v44 = vld [vmem:[#allocation5 + $0x190] sm:$0xff] }
  0x66   :  { %v210_v47 = vpack.c.bf16 %v172_v44, %v170_v43  ;;  %v174_v49 = vld [vmem:[#allocation5 + $0x1a0] sm:$0xff]  ;;  %v176_v50 = vld [vmem:[#allocation5 + $0x1b0] sm:$0xff] }
  0x67   :  { %v212_v53 = vpack.c.bf16 %v176_v50, %v174_v49  ;;  %v178_v55 = vld [vmem:[#allocation5 + $0x1c0] sm:$0xff]  ;;  %v180_v56 = vld [vmem:[#allocation5 + $0x1d0] sm:$0xff] }
  0x68   :  { %435 = vmatpush1.bf16.msra.mxu0 %v2121_v16  ;;  %v157_v16 = vld [vmem:[#allocation5 + $0x118] sm:$0xff]  ;;  %v214_v59 = vpack.c.bf16 %v180_v56, %v178_v55  ;;  %v182_v61 = vld [vmem:[#allocation5 + $0x1e0] sm:$0xff]  ;;  %v184_v62 = vld [vmem:[#allocation5 + $0x1f0] sm:$0xff] }
  0x69   :  { %436 = vmatprep.subr.bf16.mxu0 %v2122_v17  ;;  %v200_v17 = vpack.c.bf16 %v152_v14, %v150_v13  ;;  %v250_v4 = vld [vmem:[#allocation10] sm:$0x3] }
  0x6c   :  { %437 = vmatpush1.bf16.msra.mxu0 %v2124_v18  ;;  %v203_v18 = vpack.c.bf16 %v157_v16, %v155_v15 }
  0x6d   :  { %438 = vmatprep.subr.bf16.mxu0 %v2125_v19  ;;  %v154_v19 = vld [vmem:[#allocation5 + $0x100] sm:$0xff] }
  0x70   :  { %439 = vmatpush2.bf16.msra.mxu0 %v2127_v20  ;;  %v156_v20 = vld [vmem:[#allocation5 + $0x110] sm:$0xff] }
  0x71   :  { %440 = vmatprep.subr.bf16.mxu0 %v2128_v21  ;;  %v159_v21 = vld [vmem:[#allocation5 + $0x128] sm:$0xff] }
  0x74   :  { %441 = vmatpush2.bf16.msra.mxu0 %v2130_v22  ;;  %v161_v22 = vld [vmem:[#allocation5 + $0x138] sm:$0xff] }
  0x75   :  { %442 = vmatprep.subr.bf16.mxu0 %v2131_v23  ;;  %v202_v23 = vpack.c.bf16 %v156_v20, %v154_v19 }
  0x78   :  { %443 = vmatpush2.bf16.msra.mxu0 %v2133_v24  ;;  %v205_v24 = vpack.c.bf16 %v161_v22, %v159_v21 }
  0x79   :  { %444 = vmatprep.subr.bf16.mxu0 %v2134_v25  ;;  %v158_v25 = vld [vmem:[#allocation5 + $0x120] sm:$0xff] }
  0x7c   :  { %445 = vmatpush2.bf16.msra.mxu0 %v2136_v26  ;;  %v160_v26 = vld [vmem:[#allocation5 + $0x130] sm:$0xff] }
  0x7d   :  { %446 = vmatprep.subr.bf16.mxu0 %v2137_v27  ;;  %v163_v27 = vld [vmem:[#allocation5 + $0x148] sm:$0xff] }
  0x80   :  { %447 = vmatpush2.bf16.msra.mxu0 %v2139_v28  ;;  %v165_v28 = vld [vmem:[#allocation5 + $0x158] sm:$0xff] }
  0x81   :  { %448 = vmatprep.subr.bf16.mxu0 %v2140_v29  ;;  %v204_v29 = vpack.c.bf16 %v160_v26, %v158_v25 }
  0x84   :  { %449 = vmatpush2.bf16.msra.mxu0 %v2142_v30  ;;  %v207_v30 = vpack.c.bf16 %v165_v28, %v163_v27 }
  0x85   :  { %450 = vmatprep.subr.bf16.mxu0 %v2143_v31  ;;  %v162_v31 = vld [vmem:[#allocation5 + $0x140] sm:$0xff] }
  0x88   :  { %451 = vmatpush2.bf16.msra.mxu0 %v2145_v32  ;;  %v164_v32 = vld [vmem:[#allocation5 + $0x150] sm:$0xff] }
  0x89   :  { %452 = vmatprep.subr.bf16.mxu0 %v2146_v33  ;;  %v167_v33 = vld [vmem:[#allocation5 + $0x168] sm:$0xff]  ;;  %v206_v35 = vpack.c.bf16 %v164_v32, %v162_v31 }
  0x8c   :  { %453 = vmatpush2.bf16.msra.mxu0 %v2148_v34  ;;  %v169_v34 = vld [vmem:[#allocation5 + $0x178] sm:$0xff] }
  0x8d   :  { %v209_v36 = vpack.c.bf16 %v169_v34, %v167_v33 }
  0x8f   :  { %455 = vmatmul.mubr.bf16.vlgmr.msra.gmra.mxu0 %v186_v39  ;;  %v171_v39 = vld [vmem:[#allocation5 + $0x188] sm:$0xff] }
  0x90   :  { %464 = vmatprep.mubr.bf16.mxu0 %v189_v40  ;;  %v173_v40 = vld [vmem:[#allocation5 + $0x198] sm:$0xff] }
  0x91   :  { %v211_v42 = vpack.c.bf16 %v173_v40, %v171_v39 }
  0x97   :  { %465 = vmatmul.mubr.bf16.gmra.mxu0 %v188_v45  ;;  %v175_v45 = vld [vmem:[#allocation5 + $0x1a8] sm:$0xff] }
  0x98   :  { %474 = vmatprep.mubr.bf16.mxu0 %v191_v46  ;;  %v177_v46 = vld [vmem:[#allocation5 + $0x1b8] sm:$0xff] }
  0x99   :  { %v213_v48 = vpack.c.bf16 %v177_v46, %v175_v45 }
  0x9f   :  { %475 = vmatmul.mubr.bf16.gmra.mxu0 %v190_v51  ;;  %v179_v51 = vld [vmem:[#allocation5 + $0x1c8] sm:$0xff] }
  0xa0   :  { %484 = vmatprep.mubr.bf16.mxu0 %v193_v52  ;;  %v181_v52 = vld [vmem:[#allocation5 + $0x1d8] sm:$0xff] }
  0xa1   :  { %v215_v54 = vpack.c.bf16 %v181_v52, %v179_v51 }
  0xa7   :  { %485 = vmatmul.mubr.bf16.gmra.mxu0 %v192_v57  ;;  %v183_v57 = vld [vmem:[#allocation5 + $0x1e8] sm:$0xff] }
  0xa8   :  { %494 = vmatprep.mubr.bf16.mxu0 %v195_v58  ;;  %v185_v58 = vld [vmem:[#allocation5 + $0x1f8] sm:$0xff] }
  0xa9   :  { %v217_v60 = vpack.c.bf16 %v185_v58, %v183_v57 }
  0xaf   :  { %495 = vmatmul.mubr.bf16.gmra.mxu0 %v194_v63  ;;  %v216_v63 = vpack.c.bf16 %v184_v62, %v182_v61 }
  0xb0   :  { %504 = vmatprep.mubr.bf16.mxu0 %v197_v0  ;;  %v2900_v0 = vlaneseq }
  0xb2   :  { %v2532_v1 = vshrl.u32 %v2900_v0, 7 }
  0xb4   :  { %2911 = vst [vmem:[#allocation22_spill] sm:$0xff] %v2532_v1  ;;  %v2899_v2 = vsub.s32 1, %v2532_v1  ;;  %v2898_v3 = vsub.s32 0, %v2532_v1 }
  0xb6   :  { %v2542_v7 = vrot.slane %v250_v4, %v2898_v3 }
  0xb7   :  { %505 = vmatmul.mubr.bf16.gmra.mxu0 %v196_v5 }
  0xb8   :  { %514 = vmatprep.mubr.bf16.mxu0 %v199_v6  ;;  %v2538_v6 = vrot.slane %v250_v4, %v2899_v2 }
  0xbf   :  { %515 = vmatmul.mubr.bf16.gmra.mxu0 %v198_v11 }
  0xc0   :  { %524 = vmatprep.mubr.bf16.mxu0 %v201_v12 }
  0xc7   :  { %525 = vmatmul.mubr.bf16.gmra.mxu0 %v200_v17 }
  0xc8   :  { %534 = vmatprep.mubr.bf16.mxu0 %v203_v18 }
  0xcf   :  { %535 = vmatmul.mubr.bf16.gmra.mxu0 %v202_v23 }
  0xd0   :  { %544 = vmatprep.mubr.bf16.mxu0 %v205_v24 }
  0xd7   :  { %545 = vmatmul.mubr.bf16.gmra.mxu0 %v204_v29 }
  0xd8   :  { %554 = vmatprep.mubr.bf16.mxu0 %v207_v30 }
  0xdf   :  { %555 = vmatmul.mubr.bf16.gmra.mxu0 %v206_v35 }
  0xe0   :  { %564 = vmatprep.mubr.bf16.mxu0 %v209_v36 }
  0xe7   :  { %565 = vmatmul.mubr.bf16.gmra.mxu0 %v208_v41 }
  0xe8   :  { %574 = vmatprep.mubr.bf16.mxu0 %v211_v42 }
  0xef   :  { %575 = vmatmul.mubr.bf16.gmra.mxu0 %v210_v47 }
  0xf0   :  { %584 = vmatprep.mubr.bf16.mxu0 %v213_v48 }
  0xf7   :  { %585 = vmatmul.mubr.bf16.gmra.mxu0 %v212_v53 }
  0xf8   :  { %594 = vmatprep.mubr.bf16.mxu0 %v215_v54 }
  0xff   :  { %595 = vmatmul.mubr.bf16.gmra.mxu0 %v214_v59 }
 0x100   :  { %604 = vmatprep.mubr.bf16.mxu0 %v217_v60 }
 0x107   :  { %605 = vmatmul.mubr.bf16.gmra.mxu0 %v216_v63 }
 0x14f   :  { %v456_v5 = vpop.f32.mrf.mxu0 }
 0x150   :  { %v2546_v11 = vadd.f32 %v456_v5, %v2542_v7 }
 0x151   :  { %v458_v8 = vpop.f32.mrf.mxu0 }
 0x152   :  { %v459_v9 = vadd.f32 %v458_v8, %v2538_v6 }
 0x153   :  { %v460_v10 = vpop.f32.mrf.mxu0 }
 0x154   :  { %v2549_v12 = vadd.f32 %v460_v10, %v2542_v7  ;;  %2213 = vtanh.f32 %v459_v9 }
 0x155   :  { %v462_v13 = vpop.f32.mrf.mxu0 }
 0x156   :  { %v463_v15 = vadd.f32 %v462_v13, %v2538_v6 }
 0x157   :  { %v466_v16 = vpop.f32.mrf.mxu0 }
 0x158   :  { %2215 = vtanh.f32 %v463_v15  ;;  %v2556_v20 = vadd.f32 %v466_v16, %v2542_v7 }
 0x159   :  { %v468_v17 = vpop.f32.mrf.mxu0 }
 0x15a   :  { %v469_v18 = vadd.f32 %v468_v17, %v2538_v6 }
 0x15b   :  { %v470_v19 = vpop.f32.mrf.mxu0 }
 0x15c   :  { %v2559_v21 = vadd.f32 %v470_v19, %v2542_v7  ;;  %2217 = vtanh.f32 %v469_v18 }
 0x15d   :  { %v472_v22 = vpop.f32.mrf.mxu0 }
 0x15e   :  { %v473_v24 = vadd.f32 %v472_v22, %v2538_v6 }
 0x15f   :  { %v476_v25 = vpop.f32.mrf.mxu0 }
 0x160   :  { %2219 = vtanh.f32 %v473_v24  ;;  %v2568_v30 = vadd.f32 %v476_v25, %v2542_v7 }
 0x161   :  { %v478_v26 = vpop.f32.mrf.mxu0  ;;  %v2565_v29 = vpop.eup %2213 }
 0x162   :  { %v479_v27 = vadd.f32 %v478_v26, %v2538_v6 }
 0x163   :  { %v480_v28 = vpop.f32.mrf.mxu0 }
 0x164   :  { %v2571_v31 = vadd.f32 %v480_v28, %v2542_v7  ;;  %2221 = vtanh.f32 %v479_v27 }
 0x165   :  { %v2573_v32 = vpop.eup %2215  ;;  %v482_v33 = vpop.f32.mrf.mxu0 }
 0x166   :  { %v483_v35 = vadd.f32 %v482_v33, %v2538_v6 }
 0x167   :  { %v486_v37 = vpop.f32.mrf.mxu0 }
 0x168   :  { %2223 = vtanh.f32 %v483_v35  ;;  %v2584_v42 = vadd.f32 %v486_v37, %v2542_v7 }
 0x169   :  { %v488_v38 = vpop.f32.mrf.mxu0  ;;  %v2581_v41 = vpop.eup %2217 }
 0x16a   :  { %v489_v39 = vadd.f32 %v488_v38, %v2538_v6 }
 0x16b   :  { %v490_v40 = vpop.f32.mrf.mxu0 }
 0x16c   :  { %v2587_v43 = vadd.f32 %v490_v40, %v2542_v7  ;;  %2225 = vtanh.f32 %v489_v39 }
 0x16d   :  { %v2589_v44 = vpop.eup %2219  ;;  %v492_v45 = vpop.f32.mrf.mxu0 }
 0x16e   :  { %v493_v47 = vadd.f32 %v492_v45, %v2538_v6 }
 0x16f   :  { %v496_v49 = vpop.f32.mrf.mxu0 }
 0x170   :  { %2227 = vtanh.f32 %v493_v47  ;;  %v2600_v54 = vadd.f32 %v496_v49, %v2542_v7 }
 0x171   :  { %v498_v50 = vpop.f32.mrf.mxu0  ;;  %v2597_v53 = vpop.eup %2221 }
 0x172   :  { %v499_v51 = vadd.f32 %v498_v50, %v2538_v6 }
 0x173   :  { %v500_v52 = vpop.f32.mrf.mxu0 }
 0x174   :  { %v2603_v55 = vadd.f32 %v500_v52, %v2542_v7  ;;  %2229 = vtanh.f32 %v499_v51 }
 0x175   :  { %v2605_v56 = vpop.eup %2223  ;;  %v502_v57 = vpop.f32.mrf.mxu0 }
 0x176   :  { %v503_v59 = vadd.f32 %v502_v57, %v2538_v6 }
 0x177   :  { %v506_v61 = vpop.f32.mrf.mxu0 }
 0x178   :  { %2231 = vtanh.f32 %v503_v59  ;;  %v2616_v8 = vadd.f32 %v506_v61, %v2542_v7 }
 0x179   :  { %v508_v62 = vpop.f32.mrf.mxu0  ;;  %v2613_v5 = vpop.eup %2225 }
 0x17a   :  { %v509_v63 = vadd.f32 %v508_v62, %v2538_v6 }
 0x17b   :  { %v510_v4 = vpop.f32.mrf.mxu0 }
 0x17c   :  { %v2619_v9 = vadd.f32 %v510_v4, %v2542_v7  ;;  %2233 = vtanh.f32 %v509_v63 }
 0x17d   :  { %v2621_v10 = vpop.eup %2227  ;;  %v512_v13 = vpop.f32.mrf.mxu0 }
 0x17e   :  { %v513_v16 = vadd.f32 %v512_v13, %v2538_v6 }
 0x17f   :  { %v516_v18 = vpop.f32.mrf.mxu0 }
 0x180   :  { %2235 = vtanh.f32 %v513_v16  ;;  %v2632_v26 = vadd.f32 %v516_v18, %v2542_v7 }
 0x181   :  { %v518_v19 = vpop.f32.mrf.mxu0  ;;  %v2629_v25 = vpop.eup %2229 }
 0x182   :  { %v519_v22 = vadd.f32 %v518_v19, %v2538_v6 }
 0x183   :  { %v520_v24 = vpop.f32.mrf.mxu0 }
 0x184   :  { %v2635_v27 = vadd.f32 %v520_v24, %v2542_v7  ;;  %2237 = vtanh.f32 %v519_v22 }
 0x185   :  { %v2637_v28 = vpop.eup %2231  ;;  %v522_v33 = vpop.f32.mrf.mxu0 }
 0x186   :  { %v523_v37 = vadd.f32 %v522_v33, %v2538_v6 }
 0x187   :  { %v526_v39 = vpop.f32.mrf.mxu0 }
 0x188   :  { %2239 = vtanh.f32 %v523_v37  ;;  %v2648_v50 = vadd.f32 %v526_v39, %v2542_v7  ;;  %v2901_v37 = vmov 0  }
 0x189   :  { %v528_v40 = vpop.f32.mrf.mxu0  ;;  %v2645_v49 = vpop.eup %2233  ;;  %2099 = vset.pattern.permute.xlu0 %v2901_v37  ;;  %2100 = vset.pattern.permute.xlu1 %v2901_v37 }
 0x18a   :  { %v529_v45 = vadd.f32 %v528_v40, %v2538_v6 }
 0x18b   :  { %v530_v47 = vpop.f32.mrf.mxu0 }
 0x18c   :  { %v2651_v51 = vadd.f32 %v530_v47, %v2542_v7  ;;  %2241 = vtanh.f32 %v529_v45 }
 0x18d   :  { %v2653_v52 = vpop.eup %2235  ;;  %v532_v57 = vpop.f32.mrf.mxu0 }
 0x18e   :  { %v533_v61 = vadd.f32 %v532_v57, %v2538_v6  ;;  %v2679_v57 = vld [vmem:[%s2890_s3] sm:$0xf] }
 0x18f   :  { %v536_v63 = vpop.f32.mrf.mxu0  ;;  %1940 = vmatprep.mubr.bf16.mxu1 %v2679_v57 }
 0x190   :  { %2243 = vtanh.f32 %v533_v61  ;;  %v2664_v19 = vadd.f32 %v536_v63, %v2542_v7 }
 0x191   :  { %v538_v4 = vpop.f32.mrf.mxu0  ;;  %v2661_v18 = vpop.eup %2237 }
 0x192   :  { %v539_v13 = vadd.f32 %v538_v4, %v2538_v6  ;;  %2912 = vst [vmem:[#allocation23_spill] sm:$0xff] %v2664_v19 }
 0x193   :  { %v540_v16 = vpop.f32.mrf.mxu0 }
 0x194   :  { %v2667_v22 = vadd.f32 %v540_v16, %v2542_v7  ;;  %2245 = vtanh.f32 %v539_v13 }
 0x195   :  { %v2669_v24 = vpop.eup %2239  ;;  %v542_v33 = vpop.f32.mrf.mxu0 }
 0x196   :  { %2913 = vst [vmem:[#allocation24_spill] sm:$0xff] %v2667_v22  ;;  %v543_v39 = vadd.f32 %v542_v33, %v2538_v6 }
 0x197   :  { %v546_v45 = vpop.f32.mrf.mxu0 }
 0x198   :  { %2247 = vtanh.f32 %v543_v39  ;;  %v2686_v16 = vadd.f32 %v546_v45, %v2542_v7 }
 0x199   :  { %v548_v47 = vpop.f32.mrf.mxu0  ;;  %v2683_v4 = vpop.eup %2241 }
 0x19a   :  { %v549_v61 = vadd.f32 %v548_v47, %v2538_v6  ;;  %2914 = vst [vmem:[#allocation25_spill] sm:$0xff] %v2686_v16 }
 0x19b   :  { %v550_v63 = vpop.f32.mrf.mxu0 }
 0x19c   :  { %v2689_v13 = vadd.f32 %v550_v63, %v2542_v7  ;;  %2249 = vtanh.f32 %v549_v61 }
 0x19d   :  { %v2691_v33 = vpop.eup %2243  ;;  %v552_v39 = vpop.f32.mrf.mxu0 }
 0x19e   :  { %2915 = vst [vmem:[#allocation26_spill] sm:$0xff] %v2689_v13  ;;  %v553_v2 = vadd.f32 %v552_v39, %v2538_v6 }
 0x19f   :  { %v556_v0 = vpop.f32.mrf.mxu0 }
 0x1a0   :  { %2251 = vtanh.f32 %v553_v2  ;;  %v2704_v3 = vadd.f32 %v556_v0, %v2542_v7 }
 0x1a1   :  { %v558_v45 = vpop.f32.mrf.mxu0  ;;  %v2701_v23 = vpop.eup %2245 }
 0x1a2   :  { %v559_v63 = vadd.f32 %v558_v45, %v2538_v6  ;;  %2916 = vst [vmem:[#allocation27_spill] sm:$0xff] %v2704_v3 }
 0x1a3   :  { %v560_v14 = vpop.f32.mrf.mxu0 }
 0x1a4   :  { %v2707_v39 = vadd.f32 %v560_v14, %v2542_v7  ;;  %2253 = vtanh.f32 %v559_v63 }
 0x1a5   :  { %v2709_v61 = vpop.eup %2247  ;;  %v562_v2 = vpop.f32.mrf.mxu0 }
 0x1a6   :  { %2917 = vst [vmem:[#allocation28_spill] sm:$0xff] %v2707_v39  ;;  %v563_v46 = vadd.f32 %v562_v2, %v2538_v6 }
 0x1a7   :  { %v566_v58 = vpop.f32.mrf.mxu0 }
 0x1a8   :  { %2255 = vtanh.f32 %v563_v46  ;;  %v2719_v14 = vadd.f32 %v566_v58, %v2542_v7 }
 0x1a9   :  { %v568_v15 = vpop.f32.mrf.mxu0  ;;  %v2716_v35 = vpop.eup %2249 }
 0x1ab   :  { %v570_v0 = vpop.f32.mrf.mxu0 }
 0x1ac   :  { %v2722_v59 = vadd.f32 %v570_v0, %v2542_v7 }
 0x1ad   :  { %v2724_v37 = vpop.eup %2251  ;;  %v572_v34 = vpop.f32.mrf.mxu0 }
 0x1af   :  { %v2730_v46 = vpop.f32.mrf.mxu0 }
 0x1b1   :  { %v578_v36 = vpop.f32.mrf.mxu0  ;;  %v2732_v48 = vpop.eup %2253 }
 0x1b3   :  { %v580_v45 = vpop.f32.mrf.mxu0 }
 0x1b5   :  { %v2256_v58 = vpop.eup %2255  ;;  %v582_v60 = vpop.f32.mrf.mxu0 }
 0x1b6   :  { %v827_v0 = vpack.c.bf16 %v2256_v58, %v2732_v48  ;;  %v569_v58 = vadd.f32 %v568_v15, %v2538_v6  ;;  %v2921_v15 = vpack.c.bf16 %v2637_v28, %v2629_v25  ;;  %v2926_v25 = vpack.c.bf16 %v2709_v61, %v2701_v23 }
 0x1b7   :  { %v586_v17 = vpop.f32.mrf.mxu0  ;;  %v2931_v23 = vpack.c.bf16 %v2619_v9, %v2616_v8  ;;  %v2944_v8 = vld [vmem:[#allocation24_spill] sm:$0xff]  ;;  %v2945_v9 = vld [vmem:[#allocation23_spill] sm:$0xff]  ;;  %v2947_v28 = vlaneseq }
 0x1b8   :  { %v833_v17 = vld [vmem:[#allocation11] sm:$0xff] }
 0x1b9   :  { %v588_v38 = vpop.f32.mrf.mxu0  ;;  %836 = vperm.xlu0 %2099, %v833_v17  }
 0x1bb   :  { %v590_v62 = vpop.f32.mrf.mxu0 }
 0x1bd   :  { %v592_v40 = vpop.f32.mrf.mxu0 }
 0x1be   :  { %v593_v62 = vadd.f32 %v592_v40, %v2538_v6 }
 0x1bf   :  { %v596_v47 = vpop.f32.mrf.mxu0 }
 0x1c1   :  { %v598_v1 = vpop.f32.mrf.mxu0 }
 0x1c2   :  { %v599_v39 = vadd.f32 %v598_v1, %v2538_v6  ;;  %v579_v1 = vadd.f32 %v578_v36, %v2538_v6  ;;  %v2919_v36 = vpack.c.bf16 %v2669_v24, %v2661_v18  ;;  %v2922_v18 = vpack.c.bf16 %v2621_v10, %v2613_v5 }
 0x1c3   :  { %v600_v2 = vpop.f32.mrf.mxu0  ;;  %v2923_v24 = vpack.c.bf16 %v2605_v56, %v2597_v53  ;;  %v2927_v5 = vpack.c.bf16 %v2573_v32, %v2565_v29  ;;  %v2928_v10 = vmov 0   ;;  %v2929_v53 = vpack.c.bf16 %v2651_v51, %v2648_v50 }
 0x1c4   :  { %v2932_v29 = vpack.c.bf16 %v2603_v55, %v2600_v54  ;;  %v2933_v32 = vpack.c.bf16 %v2587_v43, %v2584_v42  ;;  %v2935_v56 = vpack.c.bf16 %v2559_v21, %v2556_v20  ;;  %v577_v54 = vadd.f32 %v2730_v46, %v2542_v7  ;;  %v2938_v21 = vld [vmem:[#allocation28_spill] sm:$0xff]  ;;  %v2939_v7 = vld [vmem:[#allocation27_spill] sm:$0xff] }
 0x1c5   :  { %v602_v19 = vpop.f32.mrf.mxu0  ;;  %v2936_v42 = vpack.c.bf16 %v2549_v12, %v2546_v11  ;;  %v2448_v43 = vmov 0.0   ;;  %v2937_v20 = vpack.c.bf16 %v2722_v59, %v2719_v14  ;;  %v2941_v11 = vld [vmem:[#allocation26_spill] sm:$0xff]  ;;  %v2942_v12 = vld [vmem:[#allocation25_spill] sm:$0xff] }
 0x1c6   :  { %v603_v16 = vadd.f32 %v602_v19, %v2538_v6  ;;  %v2943_v55 = vpack.c.bf16 %v2941_v11, %v2942_v12  ;;  %120 = vst.msk [vmem:[#allocation3] sm:$0xff] %vm118_vm0, %v2448_v43 }
 0x1c7   :  { %v606_v22 = vpop.f32.mrf.mxu0 }
 0x1c8   :  { %2257 = vtanh.f32 %v603_v16  ;;  %v589_v22 = vadd.f32 %v588_v38, %v2538_v6  ;;  %v573_v38 = vadd.f32 %v572_v34, %v2538_v6 }
 0x1c9   :  { %v608_v63 = vpop.f32.mrf.mxu0 }
 0x1ca   :  { %v609_v45 = vadd.f32 %v608_v63, %v2538_v6 }
 0x1cb   :  { %v610_v13 = vpop.f32.mrf.mxu0 }
 0x1cc   :  { %2259 = vtanh.f32 %v609_v45  ;;  %v583_v13 = vadd.f32 %v582_v60, %v2538_v6 }
 0x1cd   :  { %v612_v3 = vpop.f32.mrf.mxu0 }
 0x1ce   :  { %v613_v48 = vadd.f32 %v612_v3, %v2538_v6 }
 0x1d0   :  { %2261 = vtanh.f32 %v613_v48 }
 0x1d1   :  { %2263 = vtanh.f32 %v599_v39  ;;  %v2918_v39 = vpack.c.bf16 %v2691_v33, %v2683_v4  ;;  %v2920_v33 = vpack.c.bf16 %v2653_v52, %v2645_v49  ;;  %v2924_v49 = vpack.c.bf16 %v2724_v37, %v2716_v35 }
 0x1d2   :  { %2265 = vtanh.f32 %v593_v62  ;;  %v2925_v52 = vpack.c.bf16 %v2589_v44, %v2581_v41  ;;  %v2930_v41 = vpack.c.bf16 %v2635_v27, %v2632_v26  ;;  %v2934_v44 = vpack.c.bf16 %v2571_v31, %v2568_v30 }
 0x1d3   :  { %2267 = vtanh.f32 %v589_v22  ;;  %v934_v30 = vpack.c.bf16 %v2448_v43, %v577_v54  ;;  %v2940_v31 = vpack.c.bf16 %v2938_v21, %v2939_v7  ;;  %v2946_v26 = vpack.c.bf16 %v2944_v8, %v2945_v9  ;;  %v2169_v54 = vld [vmem:[#allocation13 + $0x50] sm:$0xff]   ;;  %v2173_v21 = vld [vmem:[#allocation13 + $0x48] sm:$0xff]  }
 0x1d4   :  { %2269 = vtanh.f32 %v583_v13  ;;  %v2449_v27 = vmov -inf   ;;  %v716_v35 = vand.u32 127, %v2947_v28  ;;  %v2174_v7 = vld [vmem:[#allocation13 + $0x8] sm:$0xff]   ;;  %v2179_v28 = vld [vmem:[#allocation13 + $0x140] sm:$0xff]  }
 0x1d5   :  { %v2258_v19 = vpop.eup %2257  ;;  %2271 = vtanh.f32 %v579_v1  ;;  %119 = vst.msk [vmem:[#allocation2] sm:$0xff] %vm118_vm0, %v2449_v27  ;;  %v2176_v9 = vld [vmem:[#allocation13 + $0x108] sm:$0xff]   ;;  %v2178_v27 = vld [vmem:[#allocation13] sm:$0xff]  }
 0x1d6   :  { %2273 = vtanh.f32 %v573_v38  ;;  %v717_v50 = vadd.s32 128, %v716_v35  ;;  %v2180_v35 = vld [vmem:[#allocation13 + $0x100] sm:$0xff]  }
 0x1d7   :  { %2275 = vtanh.f32 %v569_v58 }
 0x1d8   :  { %vm719_vm1 = vcmp.lt.s32.totalorder %v717_v50, 200 }
 0x1d9   :  { %v2260_v47 = vpop.eup %2259 }
 0x1dd   :  { %v2262_v2 = vpop.eup %2261 }
 0x1de   :  { %v832_v16 = vpack.c.bf16 %v2262_v2, %v2260_v47  ;;  %v2264_v3 = vpop.eup %2263 }
 0x1df   :  { %v831_v63 = vpack.c.bf16 %v2258_v19, %v2264_v3  ;;  %v2266_v40 = vpop.eup %2265  ;;  %v886_v19 = vld [vmem:[#allocation2] sm:$0xff] }
 0x1e0   :  { %1924 = vmatprep.subr.bf16.mxu1 %v832_v16  ;;  %v2268_v60 = vpop.eup %2267 }
 0x1e1   :  { %1925 = vmatpush3.bf16.xpose.msra.mxu1 %v2918_v39  ;;  %v830_v45 = vpack.c.bf16 %v2266_v40, %v2268_v60  ;;  %v2270_v48 = vpop.eup %2269 }
 0x1e2   :  { %1926 = vmatprep.subr.bf16.mxu1 %v831_v63  ;;  %v2272_v17 = vpop.eup %2271 }
 0x1e3   :  { %v829_v4 = vpack.c.bf16 %v2270_v48, %v2272_v17  ;;  %v2274_v34 = vpop.eup %2273  ;;  %v2149_v17 = vld [vmem:[#allocation13 + $0x178] sm:$0xff]  }
 0x1e4   :  { %v2276_v62 = vpop.eup %2275  ;;  %1986 = vmatprep.subr.bf16.mxu0 %v2149_v17 }
 0x1e5   :  { %v828_v6 = vpack.c.bf16 %v2274_v34, %v2276_v62  ;;  %v2155_v34 = vld [vmem:[#allocation13 + $0x78] sm:$0xff]  }
 0x1e6   :  { %v2156_v62 = vld [vmem:[#allocation13 + $0x38] sm:$0xff]  }
 0x1e9   :  { %1927 = vmatpush3.bf16.xpose.msra.mxu1 %v2919_v36 }
 0x1ea   :  { %1928 = vmatprep.subr.bf16.mxu1 %v830_v45 }
 0x1f1   :  { %1929 = vmatpush3.bf16.xpose.msra.mxu1 %v2920_v33  ;;  %v2151_v33 = vld [vmem:[#allocation13 + $0x170] sm:$0xff]  }
 0x1f2   :  { %1930 = vmatprep.subr.bf16.mxu1 %v829_v4  ;;  %v2150_v4 = vld [vmem:[#allocation13 + $0x138] sm:$0xff]  }
 0x1f3   :  { %1987 = vmatpush3.bf16.msra.mxu0 %v2150_v4  ;;  %v2183_v4 = vld [vmem:[#allocation13 + $0xf0] sm:$0xff]  }
 0x1f4   :  { %1988 = vmatprep.subr.bf16.mxu0 %v2151_v33 }
 0x1f9   :  { %1931 = vmatpush3.bf16.xpose.msra.mxu1 %v2921_v15  ;;  %v2152_v15 = vld [vmem:[#allocation13 + $0x130] sm:$0xff]  }
 0x1fa   :  { %1932 = vmatprep.subr.bf16.mxu1 %v828_v6  ;;  %v2157_v6 = vld [vmem:[#allocation13 + $0x70] sm:$0xff]   ;;  %1989 = vmatpush3.bf16.msra.mxu0 %v2152_v15  ;;  %v2187_v15 = vld [vmem:[#allocation13 + $0xe0] sm:$0xff]  }
 0x201   :  { %1933 = vmatpush3.bf16.xpose.msra.mxu1 %v2922_v18  ;;  %v2153_v18 = vld [vmem:[#allocation13 + $0x168] sm:$0xff]  }
 0x202   :  { %1934 = vmatprep.subr.bf16.mxu1 %v827_v0  ;;  %1990 = vmatprep.subr.bf16.mxu0 %v2153_v18  ;;  %v2188_v18 = vld [vmem:[#allocation13 + $0xa0] sm:$0xff]  }
 0x209   :  { %1935 = vmatpush3.bf16.xpose.msra.mxu1 %v2923_v24  ;;  %v2158_v24 = vld [vmem:[#allocation13 + $0x30] sm:$0xff]  }
 0x20a   :  { %1936 = vmatprep.subr.bf16.mxu1 %v2924_v49  ;;  %v2159_v49 = vld [vmem:[#allocation13 + $0x68] sm:$0xff]  }
 0x211   :  { %1937 = vmatpush3.bf16.xpose.msra.mxu1 %v2925_v52  ;;  %v2154_v52 = vld [vmem:[#allocation13 + $0x128] sm:$0xff]  }
 0x212   :  { %1938 = vmatprep.subr.bf16.mxu1 %v2926_v25  ;;  %v2163_v25 = vld [vmem:[#allocation13 + $0x160] sm:$0xff]   ;;  %1991 = vmatpush3.bf16.msra.mxu0 %v2154_v52  ;;  %v2191_v52 = vld [vmem:[#allocation13 + $0xd0] sm:$0xff]  }
 0x213   :  { %1992 = vmatprep.subr.bf16.mxu0 %v2163_v25  ;;  %v2192_v25 = vld [vmem:[#allocation13 + $0x90] sm:$0xff]  }
 0x219   :  { %1939 = vmatpush3.bf16.xpose.msra.mxu1 %v2927_v5  ;;  %v2160_v5 = vld [vmem:[#allocation13 + $0x28] sm:$0xff]  }
 0x21a   :  { %938 = vmatprep.subr.bf16.mxu1 %v2928_v10 }
 0x220   :  { %1941 = vmatmul.mubr.bf16.vlgmr.msra.gmra.mxu1 %v2679_v57 }
 0x221   :  { %939 = vmatpush1.bf16.msra.mxu1 %v2929_v53  ;;  %v2164_v53 = vld [vmem:[#allocation13 + $0x120] sm:$0xff]  }
 0x222   :  { %940 = vmatprep.subr.bf16.mxu1 %v2928_v10  ;;  %1993 = vmatpush3.bf16.msra.mxu0 %v2164_v53  ;;  %v2195_v53 = vld [vmem:[#allocation13 + $0xc0] sm:$0xff]  }
 0x225   :  { %941 = vmatpush1.bf16.msra.mxu1 %v2930_v41  ;;  %v2167_v41 = vld [vmem:[#allocation13 + $0x158] sm:$0xff]  }
 0x226   :  { %942 = vmatprep.subr.bf16.mxu1 %v2928_v10  ;;  %1994 = vmatprep.subr.bf16.mxu0 %v2167_v41 }
 0x229   :  { %943 = vmatpush1.bf16.msra.mxu1 %v2931_v23  ;;  %v2162_v23 = vld [vmem:[#allocation13 + $0x20] sm:$0xff]  }
 0x22a   :  { %944 = vmatprep.subr.bf16.mxu1 %v2928_v10 }
 0x22d   :  { %945 = vmatpush1.bf16.msra.mxu1 %v2932_v29  ;;  %v2165_v29 = vld [vmem:[#allocation13 + $0x58] sm:$0xff]  }
 0x22e   :  { %946 = vmatprep.subr.bf16.mxu1 %v2928_v10 }
 0x231   :  { %947 = vmatpush1.bf16.msra.mxu1 %v2933_v32  ;;  %v2168_v32 = vld [vmem:[#allocation13 + $0x118] sm:$0xff]  }
 0x232   :  { %948 = vmatprep.subr.bf16.mxu1 %v2928_v10  ;;  %1995 = vmatpush3.bf16.msra.mxu0 %v2168_v32 }
 0x234   :  { %v837_v59 = vpop.permute.xlu0 %836 }
 0x235   :  { %949 = vmatpush1.bf16.msra.mxu1 %v2934_v44  ;;  %v2171_v44 = vld [vmem:[#allocation13 + $0x150] sm:$0xff]  }
 0x236   :  { %950 = vmatprep.subr.bf16.mxu1 %v2928_v10  ;;  %1996 = vmatprep.subr.bf16.mxu0 %v2171_v44  ;;  %v2197_v44 = vld [vmem:[#allocation13 + $0x1f8] sm:$0xff]  }
 0x239   :  { %951 = vmatpush1.bf16.msra.mxu1 %v2935_v56  ;;  %v2166_v56 = vld [vmem:[#allocation13 + $0x18] sm:$0xff]  }
 0x23a   :  { %952 = vmatprep.subr.bf16.mxu1 %v2928_v10 }
 0x23d   :  { %953 = vmatpush1.bf16.msra.mxu1 %v2936_v42  ;;  %v2172_v42 = vld [vmem:[#allocation13 + $0x110] sm:$0xff]  }
 0x23e   :  { %960 = vmatprep.subr.bf16.mxu1 %v2928_v10  ;;  %1997 = vmatpush3.bf16.msra.mxu0 %v2172_v42 }
 0x241   :  { %961 = vmatpush2.bf16.msra.mxu1 %v934_v30  ;;  %v2175_v30 = vld [vmem:[#allocation13 + $0x148] sm:$0xff]  }
 0x242   :  { %962 = vmatprep.subr.bf16.mxu1 %v2928_v10  ;;  %1998 = vmatprep.subr.bf16.mxu0 %v2175_v30  ;;  %v2199_v30 = vld [vmem:[#allocation13 + $0x1f0] sm:$0xff]  }
 0x243   :  { %1999 = vmatpush3.bf16.msra.mxu0 %v2176_v9  ;;  %v2207_v9 = vld [vmem:[#allocation13 + $0x1d0] sm:$0xff]  }
 0x244   :  { %2000 = vmatprep.subr.bf16.mxu0 %v2179_v28  ;;  %v2210_v28 = vld [vmem:[#allocation13 + $0x188] sm:$0xff]  }
 0x245   :  { %963 = vmatpush2.bf16.msra.mxu1 %v2937_v20  ;;  %v2170_v20 = vld [vmem:[#allocation13 + $0x10] sm:$0xff]  }
 0x246   :  { %964 = vmatprep.subr.bf16.mxu1 %v2928_v10 }
 0x247   :  { %2001 = vmatpush3.bf16.msra.mxu0 %v2180_v35  ;;  %v2211_v35 = vld [vmem:[#allocation13 + $0x1c0] sm:$0xff]  }
 0x248   :  { %2047 = vmatprep.subr.mxu0 %v2448_v43 }
 0x249   :  { %965 = vmatpush2.bf16.msra.mxu1 %v2940_v31  ;;  %v905_v31 = vld [vmem:[#allocation3] sm:$0xff] }
 0x24a   :  { %966 = vmatprep.subr.bf16.mxu1 %v2928_v10 }
 0x24d   :  { %967 = vmatpush2.bf16.msra.mxu1 %v2943_v55 }
 0x24e   :  { %968 = vmatprep.subr.bf16.mxu1 %v2928_v10  ;;  %v2161_v10 = vld [vmem:[#allocation13 + $0x60] sm:$0xff]  }
 0x251   :  { %969 = vmatpush2.bf16.msra.mxu1 %v2946_v26  ;;  %v2177_v26 = vld [vmem:[#allocation13 + $0x40] sm:$0xff]  }
 0x252   :  { %1942 = vmatprep.subr.bf16.mxu1 %v2155_v34  ;;  %v2184_v34 = vld [vmem:[#allocation13 + $0xb0] sm:$0xff]  }
 0x2e0   :  { %v873_v51 = vpop.f32.mrf.mxu1 }
 0x2e1   :  { %v874_v61 = vadd.f32 %v873_v51, %v837_v59  ;;  %v2181_v51 = vld [vmem:[#allocation13 + $0xf8] sm:$0xff]  }
 0x2e2   :  { %v875_v37 = vpop.f32.mrf.mxu1 }
 0x2e3   :  { %v876_v57 = vadd.f32 %v875_v37, %v837_v59 }
 0x2e4   :  { %v877_v14 = vpop.f32.mrf.mxu1 }
 0x2e5   :  { %v885_v46 = vsel %vm719_vm1, %v876_v57, -1e+30 }
 0x2e6   :  { %v878_v0 = vpop.f32.mrf.mxu1  ;;  %v887_v22 = vmax.f32 %v874_v61, %v885_v46 }
 0x2e8   :  { %888 = vmax.xlane.f32.xlu0 %v887_v22  ;;  %v2948_v22 = vld [vmem:[#allocation22_spill] sm:$0xff] }
 0x2e9   :  { %v1004_v41 = vsub.s32 2, %v2948_v22 }
 0x371   :  { %v889_v47 = vpop.xlane.xlu0 %888 }
 0x372   :  { %v890_v13 = vmax.f32 %v886_v19, %v889_v47  ;;  %v1012_v47 = vsub.s32 4, %v2948_v22 }
 0x374   :  { %v891_v2 = vsub.f32 %v886_v19, %v890_v13  ;;  %980 = vst.msk [vmem:[#allocation2] sm:$0xff] %vm118_vm0, %v890_v13  ;;  %896 = vperm.xlu1 %2100, %v890_v13   ;;  %v1016_v19 = vsub.s32 5, %v2948_v22 }
 0x376   :  { %v892_v1 = vmul.f32 1.442695, %v891_v2  ;;  %v1008_v2 = vsub.s32 3, %v2948_v22 }
 0x378   :  { %2277 = vpow2.f32 %v892_v1 }
 0x385   :  { %v2833_v16 = vpop.eup %2277 }
 0x386   :  { %916 = vperm.xlu0 %2099, %v2833_v16   ;;  %v906_v11 = vmul.f32 %v2833_v16, %v905_v31  ;;  %v2949_v16 = vsub.s32 1, %v2948_v22  ;;  %v2202_v31 = vld [vmem:[#allocation13 + $0x1a8] sm:$0xff]  }
 0x3ef   :  { %v897_v3 = vpop.permute.xlu1 %896 }
 0x3f0   :  { %v899_v63 = vsub.f32 %v874_v61, %v897_v3  ;;  %v900_v39 = vsub.f32 %v885_v46, %v897_v3 }
 0x3f2   :  { %v901_v38 = vmul.f32 1.442695, %v899_v63  ;;  %v903_v40 = vmul.f32 1.442695, %v900_v39  ;;  %v2950_v39 = vsub.s32 0, %v2948_v22 }
 0x3f4   :  { %2279 = vpow2.f32 %v901_v38 }
 0x3f5   :  { %2281 = vpow2.f32 %v903_v40 }
 0x401   :  { %v2280_v58 = vpop.eup %2279  ;;  %v917_v14 = vpop.permute.xlu0 %916 }
 0x402   :  { %v2282_v60 = vpop.eup %2281  ;;  %v920_v45 = vpack.c.bf16 %v2280_v58, %v2280_v58  ;;  %v919_v46 = vmul.f32 0.0, %v917_v14  ;;  %v1730_v14 = vld [vmem:[#allocation14 + $0x68] sm:$0xff] }
 0x403   :  { %v921_v36 = vpack.c.bf16 %v2282_v60, %v2282_v60  ;;  %v907_v48 = vadd.f32 %v2282_v60, %v2280_v58 }
 0x405   :  { %970 = vmatprep.mubr.bf16.mxu1 %v921_v36  ;;  %908 = vadd.xlane.f32.xlu1 %v907_v48  ;;  %v2182_v48 = vld [vmem:[#allocation13 + $0xb8] sm:$0xff]  }
 0x406   :  { %971 = vmatmul.mubr.bf16.vlgmr.msra.gmra.mxu1 %v920_v45 }
 0x407   :  { %1943 = vmatpush3.bf16.msra.mxu1 %v2156_v62  ;;  %v2185_v62 = vld [vmem:[#allocation13 + $0xe8] sm:$0xff]  }
 0x408   :  { %1944 = vmatprep.subr.bf16.mxu1 %v2157_v6  ;;  %v2186_v6 = vld [vmem:[#allocation13 + $0xa8] sm:$0xff]  }
 0x40b   :  { %1945 = vmatpush3.bf16.msra.mxu1 %v2158_v24  ;;  %v2189_v24 = vld [vmem:[#allocation13 + $0xd8] sm:$0xff]  }
 0x40c   :  { %1946 = vmatprep.subr.bf16.mxu1 %v2159_v49  ;;  %v2190_v49 = vld [vmem:[#allocation13 + $0x98] sm:$0xff]  }
 0x40f   :  { %1947 = vmatpush3.bf16.msra.mxu1 %v2160_v5  ;;  %v2193_v5 = vld [vmem:[#allocation13 + $0xc8] sm:$0xff]  }
 0x410   :  { %1948 = vmatprep.subr.bf16.mxu1 %v2161_v10  ;;  %v2194_v10 = vld [vmem:[#allocation13 + $0x88] sm:$0xff]  }
 0x413   :  { %1949 = vmatpush3.bf16.msra.mxu1 %v2162_v23  ;;  %v1024_v23 = vsub.s32 7, %v2948_v22 }
 0x414   :  { %1950 = vmatprep.subr.bf16.mxu1 %v2165_v29  ;;  %v2196_v29 = vld [vmem:[#allocation13 + $0x80] sm:$0xff]  }
 0x417   :  { %1951 = vmatpush3.bf16.msra.mxu1 %v2166_v56 }
 0x418   :  { %1952 = vmatprep.subr.bf16.mxu1 %v2169_v54  ;;  %v2198_v54 = vld [vmem:[#allocation13 + $0x1b8] sm:$0xff]  }
 0x41b   :  { %1953 = vmatpush3.bf16.msra.mxu1 %v2170_v20 }
 0x41c   :  { %1954 = vmatprep.subr.bf16.mxu1 %v2173_v21  ;;  %v2200_v21 = vld [vmem:[#allocation13 + $0x1b0] sm:$0xff]  }
 0x41f   :  { %1955 = vmatpush3.bf16.msra.mxu1 %v2174_v7  ;;  %v2201_v7 = vld [vmem:[#allocation13 + $0x1e8] sm:$0xff]  }
 0x420   :  { %1956 = vmatprep.subr.bf16.mxu1 %v2177_v26  ;;  %v2208_v26 = vld [vmem:[#allocation13 + $0x190] sm:$0xff]  }
 0x423   :  { %1957 = vmatpush3.bf16.msra.mxu1 %v2178_v27  ;;  %v2209_v27 = vld [vmem:[#allocation13 + $0x1c8] sm:$0xff]  }
 0x424   :  { %1964 = vmatprep.subr.bf16.mxu1 %v2181_v51  ;;  %v2212_v51 = vld [vmem:[#allocation13 + $0x180] sm:$0xff]  }
 0x48e   :  { %v909_v12 = vpop.xlane.xlu1 %908 }
 0x48f   :  { %v910_v55 = vadd.f32 %v909_v12, %v906_v11  ;;  %v2203_v11 = vld [vmem:[#allocation13 + $0x1e0] sm:$0xff]  }
 0x490   :  { %v2204_v12 = vld [vmem:[#allocation13 + $0x1a0] sm:$0xff]  }
 0x491   :  { %912 = vst.msk [vmem:[#allocation3] sm:$0xff] %vm118_vm0, %v910_v55  ;;  %v2205_v55 = vld [vmem:[#allocation13 + $0x1d8] sm:$0xff]  }
 0x498   :  { %v984_v8 = vld [vmem:[#allocation3] sm:$0xff] }
 0x499   :  { %2283 = vrcp.f32 %v984_v8  ;;  %v2206_v8 = vld [vmem:[#allocation13 + $0x198] sm:$0xff]  }
 0x4a6   :  { %v2284_v50 = vpop.eup %2283 }
 0x4a7   :  { %989 = vperm.xlu1 %2100, %v2284_v50   ;;  %v1020_v50 = vsub.s32 6, %v2948_v22  ;;  %v1727_v22 = vld [vmem:[#allocation14 + $0x50] sm:$0xff] }
 0x4c6   :  { %v972_v59 = vpop.f32.mrf.mxu1 }
 0x4c7   :  { %v978_v0 = vadd.f32 %v972_v59, %v919_v46  ;;  %v1729_v46 = vld [vmem:[#allocation14 + $0x60] sm:$0xff] }
 0x4c8   :  { %v974_v37 = vpop.f32.mrf.mxu1 }
 0x4ca   :  { %v975_v57 = vpop.f32.mrf.mxu1 }
 0x4cb   :  { %v1732_v57 = vld [vmem:[#allocation14 + $0x78] sm:$0xff] }
 0x4cc   :  { %v976_v61 = vpop.f32.mrf.mxu1 }
 0x4cd   :  { %v1731_v61 = vld [vmem:[#allocation14 + $0x70] sm:$0xff] }
 0x522   :  { %v990_v13 = vpop.permute.xlu1 %989 }
 0x523   :  { %v2842_v1 = vmul.f32 %v990_v13, %v978_v0  ;;  %v1728_v0 = vld [vmem:[#allocation14 + $0x58] sm:$0xff] }
 0x524   :  { %v1724_v13 = vld [vmem:[#allocation14 + $0x38] sm:$0xff] }
 0x525   :  { %v1001_v3 = vrot.slane %v2842_v1, %v2949_v16  ;;  %v1017_v63 = vrot.slane %v2842_v1, %v1016_v19  ;;  %v997_v38 = vrot.slane %v2842_v1, %v2950_v39  ;;  %v1013_v40 = vrot.slane %v2842_v1, %v1012_v47  ;;  %v1726_v19 = vld [vmem:[#allocation14 + $0x48] sm:$0xff]  ;;  %v1725_v47 = vld [vmem:[#allocation14 + $0x40] sm:$0xff] }
 0x526   :  { %v1009_v58 = vrot.slane %v2842_v1, %v1008_v2  ;;  %v1005_v32 = vrot.slane %v2842_v1, %v1004_v41  ;;  %v1025_v56 = vrot.slane %v2842_v1, %v1024_v23  ;;  %v1021_v59 = vrot.slane %v2842_v1, %v1020_v50  ;;  %v1723_v2 = vld [vmem:[#allocation14 + $0x30] sm:$0xff]  ;;  %v1722_v1 = vld [vmem:[#allocation14 + $0x28] sm:$0xff]  ;;  %v1721_v16 = vld [vmem:[#allocation14 + $0x20] sm:$0xff] }
 0x527   :  { %v1035_v60 = vpack.c.bf16 %v1001_v3, %v1001_v3  ;;  %v1039_v45 = vpack.c.bf16 %v1017_v63, %v1017_v63  ;;  %v1034_v36 = vpack.c.bf16 %v997_v38, %v997_v38  ;;  %v1038_v17 = vpack.c.bf16 %v1013_v40, %v1013_v40  ;;  %v1720_v3 = vld [vmem:[#allocation14 + $0x18] sm:$0xff]  ;;  %v1719_v63 = vld [vmem:[#allocation14 + $0x10] sm:$0xff]  ;;  %v1718_v39 = vld [vmem:[#allocation14 + $0x8] sm:$0xff] }
 0x528   :  { %v1037_v33 = vpack.c.bf16 %v1009_v58, %v1009_v58  ;;  %v1036_v42 = vpack.c.bf16 %v1005_v32, %v1005_v32  ;;  %v1041_v20 = vpack.c.bf16 %v1025_v56, %v1025_v56  ;;  %v1040_v37 = vpack.c.bf16 %v1021_v59, %v1021_v59  ;;  %v1717_v38 = vld [vmem:[#allocation14] sm:$0xff] }
 0x529   :  { %1587 = vmatprep.mubr.bf16.mxu1 %v1035_v60  ;;  %1667 = vmatprep.mubr.bf16.mxu0 %v1039_v45 }
 0x52a   :  { %1588 = vmatmul.mubr.bf16.vlgmr.msra.gmra.mxu1 %v1034_v36  ;;  %1668 = vmatmul.mubr.bf16.vlgmr.msra.gmra.mxu0 %v1038_v17 }
 0x52b   :  { %1965 = vmatpush3.bf16.msra.mxu1 %v2182_v48  ;;  %1627 = vmatprep.mubr.bf16.mxu1 %v1037_v33 }
 0x52c   :  { %1966 = vmatprep.subr.bf16.mxu1 %v2183_v4  ;;  %2048 = vmatpush3.msra.mxu0 %v1732_v57 }
 0x52d   :  { %2049 = vmatprep.subr.mxu0 %v2448_v43  ;;  %2079 = vmatprep.mubr.msk.f32.mxu0 %vm2450_vm2, %v2448_v43 }
 0x52e   :  { %2050 = vmatpush3.msra.mxu0 %v1731_v61 }
 0x52f   :  { %1967 = vmatpush3.bf16.msra.mxu1 %v2184_v34  ;;  %2051 = vmatprep.subr.mxu0 %v2448_v43 }
 0x530   :  { %1968 = vmatprep.subr.bf16.mxu1 %v2185_v62  ;;  %2052 = vmatpush3.msra.mxu0 %v1730_v14 }
 0x531   :  { %2053 = vmatprep.subr.mxu0 %v2448_v43 }
 0x532   :  { %2054 = vmatpush3.msra.mxu0 %v1729_v46 }
 0x533   :  { %1969 = vmatpush3.bf16.msra.mxu1 %v2186_v6  ;;  %2055 = vmatprep.subr.mxu0 %v2448_v43 }
 0x534   :  { %1970 = vmatprep.subr.bf16.mxu1 %v2187_v15  ;;  %2056 = vmatpush3.msra.mxu0 %v1728_v0 }
 0x535   :  { %2057 = vmatprep.subr.mxu0 %v2448_v43 }
 0x536   :  { %2058 = vmatpush3.msra.mxu0 %v1727_v22 }
 0x537   :  { %1971 = vmatpush3.bf16.msra.mxu1 %v2188_v18  ;;  %2059 = vmatprep.subr.mxu0 %v2448_v43  ;;  %v1170_v18 = vld [vmem:[%s2893_s6] sm:$0x1]  ;;  %s2409_s6 = scalar_lea.vmem %s1815_s1, 32 }
 0x538   :  { %1972 = vmatprep.subr.bf16.mxu1 %v2189_v24  ;;  %2060 = vmatpush3.msra.mxu0 %v1726_v19  ;;  %p2411_p4 = scmp.lt.s32.totalorder %s2409_s6, %s2405_s28 }
 0x539   :  { %2061 = vmatprep.subr.mxu0 %v2448_v43 }
 0x53a   :  { %2062 = vmatpush3.msra.mxu0 %v1725_v47  ;;  %p2412_p5 = por %p2411_p4, %p2410_p3 }
 0x53b   :  { %1973 = vmatpush3.bf16.msra.mxu1 %v2190_v49  ;;  %2063 = vmatprep.subr.mxu0 %v2448_v43 }
 0x53c   :  { %1974 = vmatprep.subr.bf16.mxu1 %v2191_v52  ;;  %2064 = vmatpush3.msra.mxu0 %v1724_v13  ;;  %p2413_p6 = pnand %p2412_p5, %p2406_p2 }
 0x53d   :  { %2065 = vmatprep.subr.mxu0 %v2448_v43 }
 0x53e   :  { %2066 = vmatpush3.msra.mxu0 %v1723_v2 }
 0x53f   :  { %1975 = vmatpush3.bf16.msra.mxu1 %v2192_v25  ;;  %2067 = vmatprep.subr.mxu0 %v2448_v43 }
 0x540   :  { %1976 = vmatprep.subr.bf16.mxu1 %v2193_v5  ;;  %2068 = vmatpush3.msra.mxu0 %v1722_v1 }
 0x541   :  { %2069 = vmatprep.subr.mxu0 %v2448_v43 }
 0x542   :  { %2070 = vmatpush3.msra.mxu0 %v1721_v16 }
 0x543   :  { %1977 = vmatpush3.bf16.msra.mxu1 %v2194_v10  ;;  %2071 = vmatprep.subr.mxu0 %v2448_v43 }
 0x544   :  { %1978 = vmatprep.subr.bf16.mxu1 %v2195_v53  ;;  %2072 = vmatpush3.msra.mxu0 %v1720_v3 }
 0x545   :  { %2073 = vmatprep.subr.mxu0 %v2448_v43 }
 0x546   :  { %2074 = vmatpush3.msra.mxu0 %v1719_v63 }
 0x547   :  { %1979 = vmatpush3.bf16.msra.mxu1 %v2196_v29  ;;  %2075 = vmatprep.subr.mxu0 %v2448_v43 }
 0x548   :  { %2008 = vmatprep.subr.bf16.mxu1 %v2197_v44  ;;  %2076 = vmatpush3.msra.mxu0 %v1718_v39 }
 0x549   :  { %2077 = vmatprep.subr.mxu0 %v2448_v43 }
 0x54a   :  { %1628 = vmatmul.mubr.bf16.vlgmr.msra.gmra.mxu1 %v1036_v42  ;;  %2078 = vmatpush3.msra.mxu0 %v1717_v38 }
 0x54b   :  { %2009 = vmatpush3.bf16.msra.mxu1 %v2198_v54  ;;  %1707 = vmatprep.mubr.bf16.mxu1 %v1041_v20 }
 0x54c   :  { %2010 = vmatprep.subr.bf16.mxu1 %v2199_v30 }
 0x54f   :  { %2011 = vmatpush3.bf16.msra.mxu1 %v2200_v21 }
 0x550   :  { %2012 = vmatprep.subr.bf16.mxu1 %v2201_v7 }
 0x553   :  { %2013 = vmatpush3.bf16.msra.mxu1 %v2202_v31 }
 0x554   :  { %2014 = vmatprep.subr.bf16.mxu1 %v2203_v11 }
 0x557   :  { %2015 = vmatpush3.bf16.msra.mxu1 %v2204_v12 }
 0x558   :  { %2016 = vmatprep.subr.bf16.mxu1 %v2205_v55 }
 0x55b   :  { %2017 = vmatpush3.bf16.msra.mxu1 %v2206_v8 }
 0x55c   :  { %2018 = vmatprep.subr.bf16.mxu1 %v2207_v9 }
 0x55f   :  { %2019 = vmatpush3.bf16.msra.mxu1 %v2208_v26 }
 0x560   :  { %2020 = vmatprep.subr.bf16.mxu1 %v2209_v27 }
 0x563   :  { %2021 = vmatpush3.bf16.msra.mxu1 %v2210_v28 }
 0x564   :  { %2022 = vmatprep.subr.bf16.mxu1 %v2211_v35 }
 0x567   :  { %2023 = vmatpush3.bf16.msra.mxu1 %v2212_v51 }
 0x56a   :  { %1708 = vmatmul.mubr.bf16.vlgmr.msra.gmra.mxu1 %v1040_v37 }
 0x5ea   :  { %v1958_v40 = vpop.f32.mrf.mxu1  ;;  %v2002_v58 = vpop.f32.mrf.mxu0 }
 0x5ec   :  { %v1959_v60 = vpop.f32.mrf.mxu1  ;;  %v2003_v45 = vpop.f32.mrf.mxu0 }
 0x5ed   :  { %v1960_v15 = vadd.f32 %v1959_v60, %v1958_v40  ;;  %v2004_v25 = vadd.f32 %v2003_v45, %v2002_v58 }
 0x5ee   :  { %v1961_v36 = vpop.f32.mrf.mxu1  ;;  %v2005_v48 = vpop.f32.mrf.mxu0 }
 0x5ef   :  { %v1590_v49 = vadd.f32 %v1960_v15, %v1170_v18 }
 0x5f0   :  { %v1962_v17 = vpop.f32.mrf.mxu1  ;;  %v2006_v4 = vpop.f32.mrf.mxu0 }
 0x60a   :  { %v1980_v33 = vpop.f32.mrf.mxu1 }
 0x60c   :  { %v1981_v34 = vpop.f32.mrf.mxu1 }
 0x60d   :  { %v1982_v24 = vadd.f32 %v1981_v34, %v1980_v33 }
 0x60e   :  { %v1983_v62 = vpop.f32.mrf.mxu1 }
 0x60f   :  { %v1630_v43 = vadd.f32 %v1982_v24, %v1590_v49 }
 0x610   :  { %v1984_v6 = vpop.f32.mrf.mxu1 }
 0x611   :  { %v1670_v10 = vadd.f32 %v2004_v25, %v1630_v43 }
 0x62a   :  { %v2024_v52 = vpop.f32.mrf.mxu1 }
 0x62c   :  { %v2025_v5 = vpop.f32.mrf.mxu1 }
 0x62d   :  { %v2026_v53 = vadd.f32 %v2025_v5, %v2024_v52 }
 0x62e   :  { %v2027_v41 = vpop.f32.mrf.mxu1 }
 0x62f   :  { %v1710_v23 = vadd.f32 %v2026_v53, %v1670_v10 }
 0x630   :  { %v2028_v29 = vpop.f32.mrf.mxu1 }
 0x631   :  { %v1715_v32 = vmax.f32 %v1710_v23, 0.0 }
 0x633   :  { %1716 = vst [vmem:[#allocation16] sm:$0x1] %v1715_v32  ;;  %2080 = vmatmul.mubr.f32.vlgmr.msra.gmra.mxu0 %v1715_v32 }
 0x634   :  { %2416 = shalt.err (!%p2413_p6)
}
 0x635   :  { %1817 = dma.vmem_to_hbm [thread:$0]  %s1815_s1, 16, %s2897_s10, [#allocation7]   ;;  %v1733_v44 = vld [vmem:[%s2895_s8] sm:$0x1]  ;;  %vm1804_vm3 = vcmask 57344  }
 0x6f3   :  { %v1800_v56 = vpop.f32.mrf.mxu0 }
 0x6f4   :  { %v1801_v54 = vadd.f32 %v1800_v56, %v1733_v44 }
 0x6f5   :  { %v2081_v42 = vpop.f32.mrf.mxu0 }
 0x6f6   :  { %1805 = vst.msk [vmem:[%s2896_s9] sm:$0x1] %vm1804_vm3, %v1801_v54 }
 0x6f7   :  { %2433 = dma.done.wait [#allocation7], 16  }
 0x6f8   :  { %2434 = vsyncadd [#allocation7], 4294967280 }
 0x6f9   :  { %1823 = vsyncpa [#allocation6], 1 }
 0x6fa   :  { %1824 = vsyncpa [#allocation9], 1 }
 0x6fb   :  { %1825 = vsyncpa [#allocation12], 1 }
 0x6fc   :  { %1826 = vsyncpa [#allocation15], 1 }
 0x6fd   :  { %1827 = vsyncpa [#allocation7], 1 }

</bundles_post_ra>
